<compile_context>
chip_gen: v6e
topology: v6e:2x2x1
jax: 0.10.0
libtpu: 0.0.40
codegen_flags: <defaults>
</compile_context>

<pallas_src>
import functools

import jax
import jax.numpy as jnp
from jax.experimental import pallas as pl
from jax.experimental.pallas import tpu as pltpu

EPS = 1e-5          # nn.BatchNorm2d default eps
NEG_SLOPE = 0.01    # nn.LeakyReLU default negative_slope
LANE = 128
COMPUTE_DTYPE = jnp.bfloat16   # MXU operand dtype (accumulation stays f32)


# --------------------------------------------------------------------------
# Kernels
# --------------------------------------------------------------------------
def _conv_tile(a_ref, w_ref, *, tho, wo, cp):
    """3x3 'same' conv for one (batch, H-tile) block.

    a_ref : (8, (tho+1)*wo, Cin) bf16 parity slabs
    w_ref : (9, Cin, cp)         bf16 weights, tap-major (kh*3+kw)
    returns (4*m, cp) f32 conv output with rows ordered
            (pool_dh, pool_dw, out_row, out_col), m = tho*wo.
    """
    m = tho * wo

    def slab(s, t):
        # value at padded offset (2*hi + s, 2*wi + t): aligned contiguous rows.
        q = (s % 2) * 4 + (t % 2) * 2 + (t // 2)
        r0 = (s // 2) * wo
        return a_ref[q, r0:r0 + m, :]

    acc = jnp.zeros((4 * m, cp), jnp.float32)
    for kh in range(3):
        for kw in range(3):
            # the four 2x2 pooling phases stacked as contiguous row blocks
            lhs = jnp.concatenate(
                [slab(kh + 0, kw + 0), slab(kh + 0, kw + 1),
                 slab(kh + 1, kw + 0), slab(kh + 1, kw + 1)], axis=0)
            acc = acc + jnp.dot(lhs, w_ref[kh * 3 + kw],
                                preferred_element_type=jnp.float32)
    return acc


def _stats_kernel(a_ref, w_ref, out_ref, *, tho, wo, cp):
    """Phase 1: accumulate per-channel sum / sum-of-squares of conv output."""
    acc = _conv_tile(a_ref, w_ref, tho=tho, wo=wo, cp=cp)
    tile_stats = jnp.concatenate(
        [jnp.sum(acc, axis=0, keepdims=True),
         jnp.sum(acc * acc, axis=0, keepdims=True)], axis=0)       # (2, cp)

    @pl.when(pl.program_id(1) == 0)
    def _init():
        out_ref[...] = jnp.zeros_like(out_ref)

    out_ref[...] += tile_stats


def _apply_kernel(a_ref, w_ref, scale_ref, shift_ref, out_ref, *, tho, wo, cp):
    """Phase 2: conv -> fused BN affine -> LeakyReLU -> 2x2 max pool."""
    m = tho * wo
    acc = _conv_tile(a_ref, w_ref, tho=tho, wo=wo, cp=cp)
    act = acc * scale_ref[...] + shift_ref[...]
    act = jnp.where(act > 0, act, NEG_SLOPE * act)
    # the 4 pooling-window elements are 4 aligned contiguous row blocks
    pooled = jnp.maximum(jnp.maximum(act[0 * m:1 * m], act[1 * m:2 * m]),
                         jnp.maximum(act[2 * m:3 * m], act[3 * m:4 * m]))
    out_ref[...] = pooled.astype(out_ref.dtype)


# --------------------------------------------------------------------------
# Wrapper
# --------------------------------------------------------------------------
def basic_conv_block(x_nchw, w_oihw, bias, gamma, beta, *, block_ho=None):
    # Conv bias cancels exactly in training-mode BatchNorm ((y+b) - mean(y+b)).
    del bias
    N, Cin, H, W = x_nchw.shape
    Cout = w_oihw.shape[0]
    assert H % 2 == 0 and W % 2 == 0, "MaxPool2d(2,2) needs even H, W"
    Ho, Wo = H // 2, W // 2
    # TODO(synk): pad W when Wo is not a multiple of 8 (sublane alignment).
    assert Wo % 8 == 0, "this kernel assumes W is a multiple of 16"

    if block_ho is None:
        block_ho = min(Ho, 64)
    while Ho % block_ho:                 # pick a tile height dividing Ho
        block_ho -= 1
    tho = block_ho                       # pooled rows per tile
    n_t = Ho // tho                      # number of H tiles
    th = 2 * tho                         # pre-pool rows per tile
    m = tho * Wo                         # pooled pixels per tile
    R = (tho + 1) * Wo                   # rows per parity slab
    NT = N * n_t
    Cp = ((Cout + LANE - 1) // LANE) * LANE   # lane-dense padded channels

    # ---- wrapper glue: compact parity-slab layout (no 9x im2col) ----
    x = jnp.transpose(x_nchw, (0, 2, 3, 1))               # NHWC
    xp = jnp.pad(x, ((0, 0), (1, 1), (1, 1), (0, 0)))     # 'same' pad for k=3
    # H tiles with their 2-row halo: (N, n_t, th+2, W+2, Cin)
    xpt = jnp.stack(
        [xp[:, 2 * t * tho: 2 * t * tho + th + 2] for t in range(n_t)], axis=1)
    # 8 slabs indexed by (row parity sr, col parity tr, col offset tq)
    slabs = []
    for sr in range(2):
        for tr in range(2):
            for tq in range(2):
                s = xpt[:, :, sr::2, 2 * tq + tr: 2 * tq + tr + 2 * Wo: 2, :]
                slabs.append(s.reshape(NT, R, Cin))
    a_all = jnp.stack(slabs, axis=1).astype(COMPUTE_DTYPE)   # (NT, 8, R, Cin)

    # weights: (Cout,Cin,3,3) -> (9, Cin, Cp), tap-major, zero-padded channels
    w = jnp.transpose(w_oihw, (2, 3, 1, 0)).reshape(9, Cin, Cout)
    w = jnp.pad(w, ((0, 0), (0, 0), (0, Cp - Cout))).astype(COMPUTE_DTYPE)

    # ---- VMEM budget / cost hints ----
    def _pad2(r, c, itemsize):           # pad last two dims to tile granules
        sub = 32 // itemsize
        return (-(-r // sub) * sub) * (-(-c // LANE) * LANE) * itemsize

    a_block = 8 * _pad2(R, Cin, 2)
    w_bytes = 9 * _pad2(Cin, Cp, 2)
    out_block = _pad2(m, Cp, 4)
    acc_bytes = 2 * (4 * m) * Cp * 4
    est = 2 * a_block + w_bytes + 2 * out_block + acc_bytes + (1 << 20)
    vmem_limit = int(min(64 << 20, max(4 << 20, 2 * est)))

    a_in_bytes = NT * 8 * R * Cin * 2
    w_in_bytes = 9 * Cin * Cp * 2
    conv_flops = 2 * N * H * W * 9 * Cin * Cp

    x_spec = pl.BlockSpec((None, 8, R, Cin), lambda n, t: (n * n_t + t, 0, 0, 0))
    w_spec = pl.BlockSpec((9, Cin, Cp), lambda n, t: (0, 0, 0))

    # ---- phase 1: global BN statistics (tiled, accumulated across H tiles) ----
    stats = pl.pallas_call(
        functools.partial(_stats_kernel, tho=tho, wo=Wo, cp=Cp),
        grid=(N, n_t),
        in_specs=[x_spec, w_spec],
        out_specs=pl.BlockSpec((None, 2, Cp), lambda n, t: (n, 0, 0)),
        out_shape=jax.ShapeDtypeStruct((N, 2, Cp), jnp.float32),
        compiler_params=pltpu.CompilerParams(
            dimension_semantics=("parallel", "arbitrary"),
            vmem_limit_bytes=vmem_limit),
        cost_estimate=pl.CostEstimate(
            flops=conv_flops + 3 * N * H * W * Cp,
            transcendentals=0,
            bytes_accessed=a_in_bytes + w_in_bytes + N * 2 * Cp * 4),
    )(a_all, w)

    # finalize BN (tiny (Cp,)-sized math); fuse affine into one scale/shift
    count = float(N * H * W)
    mean = stats[:, 0, :].sum(axis=0) / count
    var = stats[:, 1, :].sum(axis=0) / count - mean * mean
    var = jnp.maximum(var, 0.0)          # guard E[x^2]-E[x]^2 cancellation
    rstd = jax.lax.rsqrt(var + EPS)
    gamma_p = jnp.pad(gamma.astype(jnp.float32), (0, Cp - Cout))
    beta_p = jnp.pad(beta.astype(jnp.float32), (0, Cp - Cout))
    scale = (gamma_p * rstd).reshape(1, Cp)
    shift = (beta_p - mean * gamma_p * rstd).reshape(1, Cp)

    # ---- phase 2: normalize + LeakyReLU + 2x2 max pool ----
    out2 = pl.pallas_call(
        functools.partial(_apply_kernel, tho=tho, wo=Wo, cp=Cp),
        grid=(N, n_t),
        in_specs=[x_spec, w_spec,
                  pl.BlockSpec((1, Cp), lambda n, t: (0, 0)),
                  pl.BlockSpec((1, Cp), lambda n, t: (0, 0))],
        out_specs=pl.BlockSpec((None, m, Cp), lambda n, t: (n, t, 0)),
        out_shape=jax.ShapeDtypeStruct((N, Ho * Wo, Cp), jnp.float32),
        compiler_params=pltpu.CompilerParams(
            dimension_semantics=("parallel", "parallel"),
            vmem_limit_bytes=vmem_limit),
        cost_estimate=pl.CostEstimate(
            flops=conv_flops + 8 * N * H * W * Cp,
            transcendentals=0,
            bytes_accessed=a_in_bytes + w_in_bytes + N * Ho * Wo * Cp * 4),
    )(a_all, w, scale, shift)

    out = out2[:, :, :Cout].reshape(N, Ho, Wo, Cout)
    return jnp.transpose(out, (0, 3, 1, 2))               # back to NCHW (f32)


# --------------------------------------------------------------------------
# Pure-JAX reference (matches PyTorch forward with training-mode BN)
# --------------------------------------------------------------------------
def reference(x_nchw, w_oihw, bias, gamma, beta):
    y = jax.lax.conv_general_dilated(
        x_nchw, w_oihw, window_strides=(1, 1), padding='SAME',
        dimension_numbers=('NCHW', 'OIHW', 'NCHW'))
    y = y + bias[None, :, None, None]
    mean = y.mean(axis=(0, 2, 3), keepdims=True)
    var = ((y - mean) ** 2).mean(axis=(0, 2, 3), keepdims=True)
    yn = (y - mean) / jnp.sqrt(var + EPS)
    yn = yn * gamma[None, :, None, None] + beta[None, :, None, None]
    act = jnp.where(yn > 0, yn, NEG_SLOPE * yn)
    N, C, H, W = act.shape
    a = act.reshape(N, C, H // 2, 2, W // 2, 2)
    return a.max(axis=(3, 5))


if __name__ == "__main__":
    # small shapes: batch=2, input_ch=4, output_ch=8, spatial=16
    N, Cin, Cout, H, W = 2, 4, 8, 16, 16

    key = jax.random.PRNGKey(0)
    kx, kw, kb, kg, kbeta = jax.random.split(key, 5)

    x = jax.random.normal(kx, (N, Cin, H, W), dtype=jnp.float32)
    w = 0.1 * jax.random.normal(kw, (Cout, Cin, 3, 3), dtype=jnp.float32)
    b = 0.05 * jax.random.normal(kb, (Cout,), dtype=jnp.float32)
    gamma = 1.0 + 0.1 * jax.random.normal(kg, (Cout,), dtype=jnp.float32)
    beta = 0.1 * jax.random.normal(kbeta, (Cout,), dtype=jnp.float32)

    # block_ho=4 -> 2 H-tiles per image: exercises the tiled two-phase BN path
    fwd = jax.jit(functools.partial(basic_conv_block, block_ho=4))
    out = jax.block_until_ready(fwd(x, w, b, gamma, beta))

    ref = reference(x, w, b, gamma, beta)
    assert out.shape == (N, Cout, H // 2, W // 2), out.shape
    err = float(jnp.max(jnp.abs(out - ref)))
    # bf16 MXU operands => tolerance looser than a pure-f32 pipeline
    assert err < 5e-2, f"max abs err {err}"

    print("KERNEL_OK")
</pallas_src>

<mosaic_0001>
module attributes {stable_mosaic.version = 11 : i64} {
  func.func @_stats_kernel(%arg0: i32, %arg1: i32, %arg2: memref<1x8x40x4xbf16, #tpu.memory_space<vmem>>, %arg3: memref<9x4x128xbf16, #tpu.memory_space<vmem>>, %arg4: memref<1x2x128xf32, #tpu.memory_space<vmem>>) attributes {dimension_semantics = [#tpu.dimension_semantics<parallel>, #tpu.dimension_semantics<arbitrary>], iteration_bounds = array<i64: 2, 2>, scalar_prefetch = 0 : i64, scratch_operands = 0 : i64, tpu.core_type = #tpu.core_type<tc>, window_params = [{transform_indices = @transform_0, window_bounds = array<i64: 1, 8, 40, 4>}, {pipeline_mode = #tpu.pipeline_mode<synchronous>, transform_indices = @transform_1, window_bounds = array<i64: 9, 4, 128>}, {transform_indices = @transform_2, window_bounds = array<i64: 1, 2, 128>}]} {
    %cst = arith.constant 0.000000e+00 : f32
    %0 = vector.broadcast %cst : f32 to vector<128x128xf32>
    %c0 = arith.constant 0 : index
    %c0_0 = arith.constant 0 : index
    %c0_1 = arith.constant 0 : index
    %c0_2 = arith.constant 0 : index
    %1 = vector.load %arg2[%c0, %c0_0, %c0_1, %c0_2] : memref<1x8x40x4xbf16, #tpu.memory_space<vmem>>, vector<1x1x32x4xbf16>
    %2 = vector.shape_cast %1 : vector<1x1x32x4xbf16> to vector<32x4xbf16>
    %c0_3 = arith.constant 0 : index
    %c2 = arith.constant 2 : index
    %c0_4 = arith.constant 0 : index
    %c0_5 = arith.constant 0 : index
    %3 = vector.load %arg2[%c0_3, %c2, %c0_4, %c0_5] : memref<1x8x40x4xbf16, #tpu.memory_space<vmem>>, vector<1x1x32x4xbf16>
    %4 = vector.shape_cast %3 : vector<1x1x32x4xbf16> to vector<32x4xbf16>
    %c0_6 = arith.constant 0 : index
    %c4 = arith.constant 4 : index
    %c0_7 = arith.constant 0 : index
    %c0_8 = arith.constant 0 : index
    %5 = vector.load %arg2[%c0_6, %c4, %c0_7, %c0_8] : memref<1x8x40x4xbf16, #tpu.memory_space<vmem>>, vector<1x1x32x4xbf16>
    %6 = vector.shape_cast %5 : vector<1x1x32x4xbf16> to vector<32x4xbf16>
    %c0_9 = arith.constant 0 : index
    %c6 = arith.constant 6 : index
    %c0_10 = arith.constant 0 : index
    %c0_11 = arith.constant 0 : index
    %7 = vector.load %arg2[%c0_9, %c6, %c0_10, %c0_11] : memref<1x8x40x4xbf16, #tpu.memory_space<vmem>>, vector<1x1x32x4xbf16>
    %8 = vector.shape_cast %7 : vector<1x1x32x4xbf16> to vector<32x4xbf16>
    %9 = tpu.concatenate %2, %4, %6, %8 in 0 : vector<32x4xbf16>, vector<32x4xbf16>, vector<32x4xbf16>, vector<32x4xbf16> -> vector<128x4xbf16>
    %c0_12 = arith.constant 0 : index
    %c0_13 = arith.constant 0 : index
    %c0_14 = arith.constant 0 : index
    %10 = vector.load %arg3[%c0_12, %c0_13, %c0_14] : memref<9x4x128xbf16, #tpu.memory_space<vmem>>, vector<1x4x128xbf16>
    %11 = vector.shape_cast %10 : vector<1x4x128xbf16> to vector<4x128xbf16>
    %cst_15 = arith.constant dense<0.000000e+00> : vector<128x128xf32>
    %12 = tpu.matmul %9, %11, %cst_15 {dimension_numbers = #tpu.dot_dimension_numbers<[1], [0], [0], [1], [0, 0, 1, 1], [], []>} : vector<128x4xbf16>, vector<4x128xbf16>, vector<128x128xf32> -> vector<128x128xf32>
    %13 = arith.addf %0, %12 : vector<128x128xf32>
    %c0_16 = arith.constant 0 : index
    %c2_17 = arith.constant 2 : index
    %c0_18 = arith.constant 0 : index
    %c0_19 = arith.constant 0 : index
    %14 = vector.load %arg2[%c0_16, %c2_17, %c0_18, %c0_19] : memref<1x8x40x4xbf16, #tpu.memory_space<vmem>>, vector<1x1x32x4xbf16>
    %15 = vector.shape_cast %14 : vector<1x1x32x4xbf16> to vector<32x4xbf16>
    %c0_20 = arith.constant 0 : index
    %c1 = arith.constant 1 : index
    %c0_21 = arith.constant 0 : index
    %c0_22 = arith.constant 0 : index
    %16 = vector.load %arg2[%c0_20, %c1, %c0_21, %c0_22] : memref<1x8x40x4xbf16, #tpu.memory_space<vmem>>, vector<1x1x32x4xbf16>
    %17 = vector.shape_cast %16 : vector<1x1x32x4xbf16> to vector<32x4xbf16>
    %c0_23 = arith.constant 0 : index
    %c6_24 = arith.constant 6 : index
    %c0_25 = arith.constant 0 : index
    %c0_26 = arith.constant 0 : index
    %18 = vector.load %arg2[%c0_23, %c6_24, %c0_25, %c0_26] : memref<1x8x40x4xbf16, #tpu.memory_space<vmem>>, vector<1x1x32x4xbf16>
    %19 = vector.shape_cast %18 : vector<1x1x32x4xbf16> to vector<32x4xbf16>
    %c0_27 = arith.constant 0 : index
    %c5 = arith.constant 5 : index
    %c0_28 = arith.constant 0 : index
    %c0_29 = arith.constant 0 : index
    %20 = vector.load %arg2[%c0_27, %c5, %c0_28, %c0_29] : memref<1x8x40x4xbf16, #tpu.memory_space<vmem>>, vector<1x1x32x4xbf16>
    %21 = vector.shape_cast %20 : vector<1x1x32x4xbf16> to vector<32x4xbf16>
    %22 = tpu.concatenate %15, %17, %19, %21 in 0 : vector<32x4xbf16>, vector<32x4xbf16>, vector<32x4xbf16>, vector<32x4xbf16> -> vector<128x4xbf16>
    %c1_30 = arith.constant 1 : index
    %c0_31 = arith.constant 0 : index
    %c0_32 = arith.constant 0 : index
    %23 = vector.load %arg3[%c1_30, %c0_31, %c0_32] : memref<9x4x128xbf16, #tpu.memory_space<vmem>>, vector<1x4x128xbf16>
    %24 = vector.shape_cast %23 : vector<1x4x128xbf16> to vector<4x128xbf16>
    %cst_33 = arith.constant dense<0.000000e+00> : vector<128x128xf32>
    %25 = tpu.matmul %22, %24, %cst_33 {dimension_numbers = #tpu.dot_dimension_numbers<[1], [0], [0], [1], [0, 0, 1, 1], [], []>} : vector<128x4xbf16>, vector<4x128xbf16>, vector<128x128xf32> -> vector<128x128xf32>
    %26 = arith.addf %13, %25 : vector<128x128xf32>
    %c0_34 = arith.constant 0 : index
    %c1_35 = arith.constant 1 : index
    %c0_36 = arith.constant 0 : index
    %c0_37 = arith.constant 0 : index
    %27 = vector.load %arg2[%c0_34, %c1_35, %c0_36, %c0_37] : memref<1x8x40x4xbf16, #tpu.memory_space<vmem>>, vector<1x1x32x4xbf16>
    %28 = vector.shape_cast %27 : vector<1x1x32x4xbf16> to vector<32x4xbf16>
    %c0_38 = arith.constant 0 : index
    %c3 = arith.constant 3 : index
    %c0_39 = arith.constant 0 : index
    %c0_40 = arith.constant 0 : index
    %29 = vector.load %arg2[%c0_38, %c3, %c0_39, %c0_40] : memref<1x8x40x4xbf16, #tpu.memory_space<vmem>>, vector<1x1x32x4xbf16>
    %30 = vector.shape_cast %29 : vector<1x1x32x4xbf16> to vector<32x4xbf16>
    %c0_41 = arith.constant 0 : index
    %c5_42 = arith.constant 5 : index
    %c0_43 = arith.constant 0 : index
    %c0_44 = arith.constant 0 : index
    %31 = vector.load %arg2[%c0_41, %c5_42, %c0_43, %c0_44] : memref<1x8x40x4xbf16, #tpu.memory_space<vmem>>, vector<1x1x32x4xbf16>
    %32 = vector.shape_cast %31 : vector<1x1x32x4xbf16> to vector<32x4xbf16>
    %c0_45 = arith.constant 0 : index
    %c7 = arith.constant 7 : index
    %c0_46 = arith.constant 0 : index
    %c0_47 = arith.constant 0 : index
    %33 = vector.load %arg2[%c0_45, %c7, %c0_46, %c0_47] : memref<1x8x40x4xbf16, #tpu.memory_space<vmem>>, vector<1x1x32x4xbf16>
    %34 = vector.shape_cast %33 : vector<1x1x32x4xbf16> to vector<32x4xbf16>
    %35 = tpu.concatenate %28, %30, %32, %34 in 0 : vector<32x4xbf16>, vector<32x4xbf16>, vector<32x4xbf16>, vector<32x4xbf16> -> vector<128x4xbf16>
    %c2_48 = arith.constant 2 : index
    %c0_49 = arith.constant 0 : index
    %c0_50 = arith.constant 0 : index
    %36 = vector.load %arg3[%c2_48, %c0_49, %c0_50] : memref<9x4x128xbf16, #tpu.memory_space<vmem>>, vector<1x4x128xbf16>
    %37 = vector.shape_cast %36 : vector<1x4x128xbf16> to vector<4x128xbf16>
    %cst_51 = arith.constant dense<0.000000e+00> : vector<128x128xf32>
    %38 = tpu.matmul %35, %37, %cst_51 {dimension_numbers = #tpu.dot_dimension_numbers<[1], [0], [0], [1], [0, 0, 1, 1], [], []>} : vector<128x4xbf16>, vector<4x128xbf16>, vector<128x128xf32> -> vector<128x128xf32>
    %39 = arith.addf %26, %38 : vector<128x128xf32>
    %c0_52 = arith.constant 0 : index
    %c4_53 = arith.constant 4 : index
    %c0_54 = arith.constant 0 : index
    %c0_55 = arith.constant 0 : index
    %40 = vector.load %arg2[%c0_52, %c4_53, %c0_54, %c0_55] : memref<1x8x40x4xbf16, #tpu.memory_space<vmem>>, vector<1x1x32x4xbf16>
    %41 = vector.shape_cast %40 : vector<1x1x32x4xbf16> to vector<32x4xbf16>
    %c0_56 = arith.constant 0 : index
    %c6_57 = arith.constant 6 : index
    %c0_58 = arith.constant 0 : index
    %c0_59 = arith.constant 0 : index
    %42 = vector.load %arg2[%c0_56, %c6_57, %c0_58, %c0_59] : memref<1x8x40x4xbf16, #tpu.memory_space<vmem>>, vector<1x1x32x4xbf16>
    %43 = vector.shape_cast %42 : vector<1x1x32x4xbf16> to vector<32x4xbf16>
    %c0_60 = arith.constant 0 : index
    %c0_61 = arith.constant 0 : index
    %c8 = arith.constant 8 : index
    %c0_62 = arith.constant 0 : index
    %44 = vector.load %arg2[%c0_60, %c0_61, %c8, %c0_62] : memref<1x8x40x4xbf16, #tpu.memory_space<vmem>>, vector<1x1x32x4xbf16>
    %45 = vector.shape_cast %44 : vector<1x1x32x4xbf16> to vector<32x4xbf16>
    %c0_63 = arith.constant 0 : index
    %c2_64 = arith.constant 2 : index
    %c8_65 = arith.constant 8 : index
    %c0_66 = arith.constant 0 : index
    %46 = vector.load %arg2[%c0_63, %c2_64, %c8_65, %c0_66] : memref<1x8x40x4xbf16, #tpu.memory_space<vmem>>, vector<1x1x32x4xbf16>
    %47 = vector.shape_cast %46 : vector<1x1x32x4xbf16> to vector<32x4xbf16>
    %48 = tpu.concatenate %41, %43, %45, %47 in 0 : vector<32x4xbf16>, vector<32x4xbf16>, vector<32x4xbf16>, vector<32x4xbf16> -> vector<128x4xbf16>
    %c3_67 = arith.constant 3 : index
    %c0_68 = arith.constant 0 : index
    %c0_69 = arith.constant 0 : index
    %49 = vector.load %arg3[%c3_67, %c0_68, %c0_69] : memref<9x4x128xbf16, #tpu.memory_space<vmem>>, vector<1x4x128xbf16>
    %50 = vector.shape_cast %49 : vector<1x4x128xbf16> to vector<4x128xbf16>
    %cst_70 = arith.constant dense<0.000000e+00> : vector<128x128xf32>
    %51 = tpu.matmul %48, %50, %cst_70 {dimension_numbers = #tpu.dot_dimension_numbers<[1], [0], [0], [1], [0, 0, 1, 1], [], []>} : vector<128x4xbf16>, vector<4x128xbf16>, vector<128x128xf32> -> vector<128x128xf32>
    %52 = arith.addf %39, %51 : vector<128x128xf32>
    %c0_71 = arith.constant 0 : index
    %c6_72 = arith.constant 6 : index
    %c0_73 = arith.constant 0 : index
    %c0_74 = arith.constant 0 : index
    %53 = vector.load %arg2[%c0_71, %c6_72, %c0_73, %c0_74] : memref<1x8x40x4xbf16, #tpu.memory_space<vmem>>, vector<1x1x32x4xbf16>
    %54 = vector.shape_cast %53 : vector<1x1x32x4xbf16> to vector<32x4xbf16>
    %c0_75 = arith.constant 0 : index
    %c5_76 = arith.constant 5 : index
    %c0_77 = arith.constant 0 : index
    %c0_78 = arith.constant 0 : index
    %55 = vector.load %arg2[%c0_75, %c5_76, %c0_77, %c0_78] : memref<1x8x40x4xbf16, #tpu.memory_space<vmem>>, vector<1x1x32x4xbf16>
    %56 = vector.shape_cast %55 : vector<1x1x32x4xbf16> to vector<32x4xbf16>
    %c0_79 = arith.constant 0 : index
    %c2_80 = arith.constant 2 : index
    %c8_81 = arith.constant 8 : index
    %c0_82 = arith.constant 0 : index
    %57 = vector.load %arg2[%c0_79, %c2_80, %c8_81, %c0_82] : memref<1x8x40x4xbf16, #tpu.memory_space<vmem>>, vector<1x1x32x4xbf16>
    %58 = vector.shape_cast %57 : vector<1x1x32x4xbf16> to vector<32x4xbf16>
    %c0_83 = arith.constant 0 : index
    %c1_84 = arith.constant 1 : index
    %c8_85 = arith.constant 8 : index
    %c0_86 = arith.constant 0 : index
    %59 = vector.load %arg2[%c0_83, %c1_84, %c8_85, %c0_86] : memref<1x8x40x4xbf16, #tpu.memory_space<vmem>>, vector<1x1x32x4xbf16>
    %60 = vector.shape_cast %59 : vector<1x1x32x4xbf16> to vector<32x4xbf16>
    %61 = tpu.concatenate %54, %56, %58, %60 in 0 : vector<32x4xbf16>, vector<32x4xbf16>, vector<32x4xbf16>, vector<32x4xbf16> -> vector<128x4xbf16>
    %c4_87 = arith.constant 4 : index
    %c0_88 = arith.constant 0 : index
    %c0_89 = arith.constant 0 : index
    %62 = vector.load %arg3[%c4_87, %c0_88, %c0_89] : memref<9x4x128xbf16, #tpu.memory_space<vmem>>, vector<1x4x128xbf16>
    %63 = vector.shape_cast %62 : vector<1x4x128xbf16> to vector<4x128xbf16>
    %cst_90 = arith.constant dense<0.000000e+00> : vector<128x128xf32>
    %64 = tpu.matmul %61, %63, %cst_90 {dimension_numbers = #tpu.dot_dimension_numbers<[1], [0], [0], [1], [0, 0, 1, 1], [], []>} : vector<128x4xbf16>, vector<4x128xbf16>, vector<128x128xf32> -> vector<128x128xf32>
    %65 = arith.addf %52, %64 : vector<128x128xf32>
    %c0_91 = arith.constant 0 : index
    %c5_92 = arith.constant 5 : index
    %c0_93 = arith.constant 0 : index
    %c0_94 = arith.constant 0 : index
    %66 = vector.load %arg2[%c0_91, %c5_92, %c0_93, %c0_94] : memref<1x8x40x4xbf16, #tpu.memory_space<vmem>>, vector<1x1x32x4xbf16>
    %67 = vector.shape_cast %66 : vector<1x1x32x4xbf16> to vector<32x4xbf16>
    %c0_95 = arith.constant 0 : index
    %c7_96 = arith.constant 7 : index
    %c0_97 = arith.constant 0 : index
    %c0_98 = arith.constant 0 : index
    %68 = vector.load %arg2[%c0_95, %c7_96, %c0_97, %c0_98] : memref<1x8x40x4xbf16, #tpu.memory_space<vmem>>, vector<1x1x32x4xbf16>
    %69 = vector.shape_cast %68 : vector<1x1x32x4xbf16> to vector<32x4xbf16>
    %c0_99 = arith.constant 0 : index
    %c1_100 = arith.constant 1 : index
    %c8_101 = arith.constant 8 : index
    %c0_102 = arith.constant 0 : index
    %70 = vector.load %arg2[%c0_99, %c1_100, %c8_101, %c0_102] : memref<1x8x40x4xbf16, #tpu.memory_space<vmem>>, vector<1x1x32x4xbf16>
    %71 = vector.shape_cast %70 : vector<1x1x32x4xbf16> to vector<32x4xbf16>
    %c0_103 = arith.constant 0 : index
    %c3_104 = arith.constant 3 : index
    %c8_105 = arith.constant 8 : index
    %c0_106 = arith.constant 0 : index
    %72 = vector.load %arg2[%c0_103, %c3_104, %c8_105, %c0_106] : memref<1x8x40x4xbf16, #tpu.memory_space<vmem>>, vector<1x1x32x4xbf16>
    %73 = vector.shape_cast %72 : vector<1x1x32x4xbf16> to vector<32x4xbf16>
    %74 = tpu.concatenate %67, %69, %71, %73 in 0 : vector<32x4xbf16>, vector<32x4xbf16>, vector<32x4xbf16>, vector<32x4xbf16> -> vector<128x4xbf16>
    %c5_107 = arith.constant 5 : index
    %c0_108 = arith.constant 0 : index
    %c0_109 = arith.constant 0 : index
    %75 = vector.load %arg3[%c5_107, %c0_108, %c0_109] : memref<9x4x128xbf16, #tpu.memory_space<vmem>>, vector<1x4x128xbf16>
    %76 = vector.shape_cast %75 : vector<1x4x128xbf16> to vector<4x128xbf16>
    %cst_110 = arith.constant dense<0.000000e+00> : vector<128x128xf32>
    %77 = tpu.matmul %74, %76, %cst_110 {dimension_numbers = #tpu.dot_dimension_numbers<[1], [0], [0], [1], [0, 0, 1, 1], [], []>} : vector<128x4xbf16>, vector<4x128xbf16>, vector<128x128xf32> -> vector<128x128xf32>
    %78 = arith.addf %65, %77 : vector<128x128xf32>
    %c0_111 = arith.constant 0 : index
    %c0_112 = arith.constant 0 : index
    %c8_113 = arith.constant 8 : index
    %c0_114 = arith.constant 0 : index
    %79 = vector.load %arg2[%c0_111, %c0_112, %c8_113, %c0_114] : memref<1x8x40x4xbf16, #tpu.memory_space<vmem>>, vector<1x1x32x4xbf16>
    %80 = vector.shape_cast %79 : vector<1x1x32x4xbf16> to vector<32x4xbf16>
    %c0_115 = arith.constant 0 : index
    %c2_116 = arith.constant 2 : index
    %c8_117 = arith.constant 8 : index
    %c0_118 = arith.constant 0 : index
    %81 = vector.load %arg2[%c0_115, %c2_116, %c8_117, %c0_118] : memref<1x8x40x4xbf16, #tpu.memory_space<vmem>>, vector<1x1x32x4xbf16>
    %82 = vector.shape_cast %81 : vector<1x1x32x4xbf16> to vector<32x4xbf16>
    %c0_119 = arith.constant 0 : index
    %c4_120 = arith.constant 4 : index
    %c8_121 = arith.constant 8 : index
    %c0_122 = arith.constant 0 : index
    %83 = vector.load %arg2[%c0_119, %c4_120, %c8_121, %c0_122] : memref<1x8x40x4xbf16, #tpu.memory_space<vmem>>, vector<1x1x32x4xbf16>
    %84 = vector.shape_cast %83 : vector<1x1x32x4xbf16> to vector<32x4xbf16>
    %c0_123 = arith.constant 0 : index
    %c6_124 = arith.constant 6 : index
    %c8_125 = arith.constant 8 : index
    %c0_126 = arith.constant 0 : index
    %85 = vector.load %arg2[%c0_123, %c6_124, %c8_125, %c0_126] : memref<1x8x40x4xbf16, #tpu.memory_space<vmem>>, vector<1x1x32x4xbf16>
    %86 = vector.shape_cast %85 : vector<1x1x32x4xbf16> to vector<32x4xbf16>
    %87 = tpu.concatenate %80, %82, %84, %86 in 0 : vector<32x4xbf16>, vector<32x4xbf16>, vector<32x4xbf16>, vector<32x4xbf16> -> vector<128x4xbf16>
    %c6_127 = arith.constant 6 : index
    %c0_128 = arith.constant 0 : index
    %c0_129 = arith.constant 0 : index
    %88 = vector.load %arg3[%c6_127, %c0_128, %c0_129] : memref<9x4x128xbf16, #tpu.memory_space<vmem>>, vector<1x4x128xbf16>
    %89 = vector.shape_cast %88 : vector<1x4x128xbf16> to vector<4x128xbf16>
    %cst_130 = arith.constant dense<0.000000e+00> : vector<128x128xf32>
    %90 = tpu.matmul %87, %89, %cst_130 {dimension_numbers = #tpu.dot_dimension_numbers<[1], [0], [0], [1], [0, 0, 1, 1], [], []>} : vector<128x4xbf16>, vector<4x128xbf16>, vector<128x128xf32> -> vector<128x128xf32>
    %91 = arith.addf %78, %90 : vector<128x128xf32>
    %c0_131 = arith.constant 0 : index
    %c2_132 = arith.constant 2 : index
    %c8_133 = arith.constant 8 : index
    %c0_134 = arith.constant 0 : index
    %92 = vector.load %arg2[%c0_131, %c2_132, %c8_133, %c0_134] : memref<1x8x40x4xbf16, #tpu.memory_space<vmem>>, vector<1x1x32x4xbf16>
    %93 = vector.shape_cast %92 : vector<1x1x32x4xbf16> to vector<32x4xbf16>
    %c0_135 = arith.constant 0 : index
    %c1_136 = arith.constant 1 : index
    %c8_137 = arith.constant 8 : index
    %c0_138 = arith.constant 0 : index
    %94 = vector.load %arg2[%c0_135, %c1_136, %c8_137, %c0_138] : memref<1x8x40x4xbf16, #tpu.memory_space<vmem>>, vector<1x1x32x4xbf16>
    %95 = vector.shape_cast %94 : vector<1x1x32x4xbf16> to vector<32x4xbf16>
    %c0_139 = arith.constant 0 : index
    %c6_140 = arith.constant 6 : index
    %c8_141 = arith.constant 8 : index
    %c0_142 = arith.constant 0 : index
    %96 = vector.load %arg2[%c0_139, %c6_140, %c8_141, %c0_142] : memref<1x8x40x4xbf16, #tpu.memory_space<vmem>>, vector<1x1x32x4xbf16>
    %97 = vector.shape_cast %96 : vector<1x1x32x4xbf16> to vector<32x4xbf16>
    %c0_143 = arith.constant 0 : index
    %c5_144 = arith.constant 5 : index
    %c8_145 = arith.constant 8 : index
    %c0_146 = arith.constant 0 : index
    %98 = vector.load %arg2[%c0_143, %c5_144, %c8_145, %c0_146] : memref<1x8x40x4xbf16, #tpu.memory_space<vmem>>, vector<1x1x32x4xbf16>
    %99 = vector.shape_cast %98 : vector<1x1x32x4xbf16> to vector<32x4xbf16>
    %100 = tpu.concatenate %93, %95, %97, %99 in 0 : vector<32x4xbf16>, vector<32x4xbf16>, vector<32x4xbf16>, vector<32x4xbf16> -> vector<128x4xbf16>
    %c7_147 = arith.constant 7 : index
    %c0_148 = arith.constant 0 : index
    %c0_149 = arith.constant 0 : index
    %101 = vector.load %arg3[%c7_147, %c0_148, %c0_149] : memref<9x4x128xbf16, #tpu.memory_space<vmem>>, vector<1x4x128xbf16>
    %102 = vector.shape_cast %101 : vector<1x4x128xbf16> to vector<4x128xbf16>
    %cst_150 = arith.constant dense<0.000000e+00> : vector<128x128xf32>
    %103 = tpu.matmul %100, %102, %cst_150 {dimension_numbers = #tpu.dot_dimension_numbers<[1], [0], [0], [1], [0, 0, 1, 1], [], []>} : vector<128x4xbf16>, vector<4x128xbf16>, vector<128x128xf32> -> vector<128x128xf32>
    %104 = arith.addf %91, %103 : vector<128x128xf32>
    %c0_151 = arith.constant 0 : index
    %c1_152 = arith.constant 1 : index
    %c8_153 = arith.constant 8 : index
    %c0_154 = arith.constant 0 : index
    %105 = vector.load %arg2[%c0_151, %c1_152, %c8_153, %c0_154] : memref<1x8x40x4xbf16, #tpu.memory_space<vmem>>, vector<1x1x32x4xbf16>
    %106 = vector.shape_cast %105 : vector<1x1x32x4xbf16> to vector<32x4xbf16>
    %c0_155 = arith.constant 0 : index
    %c3_156 = arith.constant 3 : index
    %c8_157 = arith.constant 8 : index
    %c0_158 = arith.constant 0 : index
    %107 = vector.load %arg2[%c0_155, %c3_156, %c8_157, %c0_158] : memref<1x8x40x4xbf16, #tpu.memory_space<vmem>>, vector<1x1x32x4xbf16>
    %108 = vector.shape_cast %107 : vector<1x1x32x4xbf16> to vector<32x4xbf16>
    %c0_159 = arith.constant 0 : index
    %c5_160 = arith.constant 5 : index
    %c8_161 = arith.constant 8 : index
    %c0_162 = arith.constant 0 : index
    %109 = vector.load %arg2[%c0_159, %c5_160, %c8_161, %c0_162] : memref<1x8x40x4xbf16, #tpu.memory_space<vmem>>, vector<1x1x32x4xbf16>
    %110 = vector.shape_cast %109 : vector<1x1x32x4xbf16> to vector<32x4xbf16>
    %c0_163 = arith.constant 0 : index
    %c7_164 = arith.constant 7 : index
    %c8_165 = arith.constant 8 : index
    %c0_166 = arith.constant 0 : index
    %111 = vector.load %arg2[%c0_163, %c7_164, %c8_165, %c0_166] : memref<1x8x40x4xbf16, #tpu.memory_space<vmem>>, vector<1x1x32x4xbf16>
    %112 = vector.shape_cast %111 : vector<1x1x32x4xbf16> to vector<32x4xbf16>
    %113 = tpu.concatenate %106, %108, %110, %112 in 0 : vector<32x4xbf16>, vector<32x4xbf16>, vector<32x4xbf16>, vector<32x4xbf16> -> vector<128x4xbf16>
    %c8_167 = arith.constant 8 : index
    %c0_168 = arith.constant 0 : index
    %c0_169 = arith.constant 0 : index
    %114 = vector.load %arg3[%c8_167, %c0_168, %c0_169] : memref<9x4x128xbf16, #tpu.memory_space<vmem>>, vector<1x4x128xbf16>
    %115 = vector.shape_cast %114 : vector<1x4x128xbf16> to vector<4x128xbf16>
    %cst_170 = arith.constant dense<0.000000e+00> : vector<128x128xf32>
    %116 = tpu.matmul %113, %115, %cst_170 {dimension_numbers = #tpu.dot_dimension_numbers<[1], [0], [0], [1], [0, 0, 1, 1], [], []>} : vector<128x4xbf16>, vector<4x128xbf16>, vector<128x128xf32> -> vector<128x128xf32>
    %117 = arith.addf %104, %116 : vector<128x128xf32>
    %cst_171 = arith.constant dense<0.000000e+00> : vector<128xf32>
    %118 = vector.multi_reduction <add>, %117, %cst_171 [0] : vector<128x128xf32> to vector<128xf32>
    %119 = vector.shape_cast %118 : vector<128xf32> to vector<1x128xf32>
    %120 = arith.mulf %117, %117 : vector<128x128xf32>
    %cst_172 = arith.constant dense<0.000000e+00> : vector<128xf32>
    %121 = vector.multi_reduction <add>, %120, %cst_172 [0] : vector<128x128xf32> to vector<128xf32>
    %122 = vector.shape_cast %121 : vector<128xf32> to vector<1x128xf32>
    %123 = tpu.concatenate %119, %122 in 0 : vector<1x128xf32>, vector<1x128xf32> -> vector<2x128xf32>
    %c0_i32 = arith.constant 0 : i32
    %124 = arith.cmpi eq, %arg1, %c0_i32 : i32
    %125 = arith.extui %124 : i1 to i32
    %c0_i32_173 = arith.constant 0 : i32
    %126 = arith.cmpi ne, %125, %c0_i32_173 : i32
    scf.if %126 {
      %cst_180 = arith.constant 0.000000e+00 : f32
      %133 = vector.broadcast %cst_180 : f32 to vector<2x128xf32>
      %c0_181 = arith.constant 0 : index
      %c0_182 = arith.constant 0 : index
      %c0_183 = arith.constant 0 : index
      %134 = vector.load %arg4[%c0_181, %c0_182, %c0_183] : memref<1x2x128xf32, #tpu.memory_space<vmem>>, vector<1x2x128xf32>
      %135 = vector.shape_cast %134 : vector<1x2x128xf32> to vector<2x128xf32>
      %136 = vector.shape_cast %133 : vector<2x128xf32> to vector<1x2x128xf32>
      tpu.vector_store %arg4[%c0_181, %c0_182, %c0_183], %136 {strides = array<i32>} : memref<1x2x128xf32, #tpu.memory_space<vmem>>, vector<1x2x128xf32>,
    } else {
    }
    %c0_174 = arith.constant 0 : index
    %c0_175 = arith.constant 0 : index
    %c0_176 = arith.constant 0 : index
    %127 = vector.load %arg4[%c0_174, %c0_175, %c0_176] : memref<1x2x128xf32, #tpu.memory_space<vmem>>, vector<1x2x128xf32>
    %128 = vector.shape_cast %127 : vector<1x2x128xf32> to vector<2x128xf32>
    %129 = arith.addf %128, %123 : vector<2x128xf32>
    %c0_177 = arith.constant 0 : index
    %c0_178 = arith.constant 0 : index
    %c0_179 = arith.constant 0 : index
    %130 = vector.load %arg4[%c0_177, %c0_178, %c0_179] : memref<1x2x128xf32, #tpu.memory_space<vmem>>, vector<1x2x128xf32>
    %131 = vector.shape_cast %130 : vector<1x2x128xf32> to vector<2x128xf32>
    %132 = vector.shape_cast %129 : vector<2x128xf32> to vector<1x2x128xf32>
    tpu.vector_store %arg4[%c0_177, %c0_178, %c0_179], %132 {strides = array<i32>} : memref<1x2x128xf32, #tpu.memory_space<vmem>>, vector<1x2x128xf32>,
    return
  }
  func.func @transform_0(%arg0: i32, %arg1: i32) -> (i32, i32, i32, i32) {
    %c2_i32 = arith.constant 2 : i32
    %0 = arith.muli %arg0, %c2_i32 : i32
    %1 = arith.addi %0, %arg1 : i32
    %c0_i32 = arith.constant 0 : i32
    %c0_i32_0 = arith.constant 0 : i32
    %c0_i32_1 = arith.constant 0 : i32
    %c0_i32_2 = arith.constant 0 : i32
    return %1, %c0_i32, %c0_i32_0, %c0_i32_1 : i32, i32, i32, i32
  }
  func.func @transform_1(%arg0: i32, %arg1: i32) -> (i32, i32, i32) {
    %c0_i32 = arith.constant 0 : i32
    %c0_i32_0 = arith.constant 0 : i32
    %c0_i32_1 = arith.constant 0 : i32
    %c0_i32_2 = arith.constant 0 : i32
    return %c0_i32, %c0_i32_0, %c0_i32_1 : i32, i32, i32
  }
  func.func @transform_2(%arg0: i32, %arg1: i32) -> (i32, i32, i32) {
    %c0_i32 = arith.constant 0 : i32
    %c0_i32_0 = arith.constant 0 : i32
    %c0_i32_1 = arith.constant 0 : i32
    return %arg0, %c0_i32, %c0_i32_0 : i32, i32, i32
  }
}

module attributes {stable_mosaic.version = 11 : i64} {
  func.func @_apply_kernel(%arg0: i32, %arg1: i32, %arg2: memref<1x8x40x4xbf16, #tpu.memory_space<vmem>>, %arg3: memref<9x4x128xbf16, #tpu.memory_space<vmem>>, %arg4: memref<1x128xf32, #tpu.memory_space<vmem>>, %arg5: memref<1x128xf32, #tpu.memory_space<vmem>>, %arg6: memref<1x32x128xf32, #tpu.memory_space<vmem>>) attributes {dimension_semantics = [#tpu.dimension_semantics<parallel>, #tpu.dimension_semantics<parallel>], iteration_bounds = array<i64: 2, 2>, scalar_prefetch = 0 : i64, scratch_operands = 0 : i64, tpu.core_type = #tpu.core_type<tc>, window_params = [{transform_indices = @transform_0, window_bounds = array<i64: 1, 8, 40, 4>}, {pipeline_mode = #tpu.pipeline_mode<synchronous>, transform_indices = @transform_1, window_bounds = array<i64: 9, 4, 128>}, {pipeline_mode = #tpu.pipeline_mode<synchronous>, transform_indices = @transform_2, window_bounds = array<i64: 1, 128>}, {pipeline_mode = #tpu.pipeline_mode<synchronous>, transform_indices = @transform_3, window_bounds = array<i64: 1, 128>}, {transform_indices = @transform_4, window_bounds = array<i64: 1, 32, 128>}]} {
    %cst = arith.constant 0.000000e+00 : f32
    %0 = vector.broadcast %cst : f32 to vector<128x128xf32>
    %c0 = arith.constant 0 : index
    %c0_0 = arith.constant 0 : index
    %c0_1 = arith.constant 0 : index
    %c0_2 = arith.constant 0 : index
    %1 = vector.load %arg2[%c0, %c0_0, %c0_1, %c0_2] : memref<1x8x40x4xbf16, #tpu.memory_space<vmem>>, vector<1x1x32x4xbf16>
    %2 = vector.shape_cast %1 : vector<1x1x32x4xbf16> to vector<32x4xbf16>
    %c0_3 = arith.constant 0 : index
    %c2 = arith.constant 2 : index
    %c0_4 = arith.constant 0 : index
    %c0_5 = arith.constant 0 : index
    %3 = vector.load %arg2[%c0_3, %c2, %c0_4, %c0_5] : memref<1x8x40x4xbf16, #tpu.memory_space<vmem>>, vector<1x1x32x4xbf16>
    %4 = vector.shape_cast %3 : vector<1x1x32x4xbf16> to vector<32x4xbf16>
    %c0_6 = arith.constant 0 : index
    %c4 = arith.constant 4 : index
    %c0_7 = arith.constant 0 : index
    %c0_8 = arith.constant 0 : index
    %5 = vector.load %arg2[%c0_6, %c4, %c0_7, %c0_8] : memref<1x8x40x4xbf16, #tpu.memory_space<vmem>>, vector<1x1x32x4xbf16>
    %6 = vector.shape_cast %5 : vector<1x1x32x4xbf16> to vector<32x4xbf16>
    %c0_9 = arith.constant 0 : index
    %c6 = arith.constant 6 : index
    %c0_10 = arith.constant 0 : index
    %c0_11 = arith.constant 0 : index
    %7 = vector.load %arg2[%c0_9, %c6, %c0_10, %c0_11] : memref<1x8x40x4xbf16, #tpu.memory_space<vmem>>, vector<1x1x32x4xbf16>
    %8 = vector.shape_cast %7 : vector<1x1x32x4xbf16> to vector<32x4xbf16>
    %9 = tpu.concatenate %2, %4, %6, %8 in 0 : vector<32x4xbf16>, vector<32x4xbf16>, vector<32x4xbf16>, vector<32x4xbf16> -> vector<128x4xbf16>
    %c0_12 = arith.constant 0 : index
    %c0_13 = arith.constant 0 : index
    %c0_14 = arith.constant 0 : index
    %10 = vector.load %arg3[%c0_12, %c0_13, %c0_14] : memref<9x4x128xbf16, #tpu.memory_space<vmem>>, vector<1x4x128xbf16>
    %11 = vector.shape_cast %10 : vector<1x4x128xbf16> to vector<4x128xbf16>
    %cst_15 = arith.constant dense<0.000000e+00> : vector<128x128xf32>
    %12 = tpu.matmul %9, %11, %cst_15 {dimension_numbers = #tpu.dot_dimension_numbers<[1], [0], [0], [1], [0, 0, 1, 1], [], []>} : vector<128x4xbf16>, vector<4x128xbf16>, vector<128x128xf32> -> vector<128x128xf32>
    %13 = arith.addf %0, %12 : vector<128x128xf32>
    %c0_16 = arith.constant 0 : index
    %c2_17 = arith.constant 2 : index
    %c0_18 = arith.constant 0 : index
    %c0_19 = arith.constant 0 : index
    %14 = vector.load %arg2[%c0_16, %c2_17, %c0_18, %c0_19] : memref<1x8x40x4xbf16, #tpu.memory_space<vmem>>, vector<1x1x32x4xbf16>
    %15 = vector.shape_cast %14 : vector<1x1x32x4xbf16> to vector<32x4xbf16>
    %c0_20 = arith.constant 0 : index
    %c1 = arith.constant 1 : index
    %c0_21 = arith.constant 0 : index
    %c0_22 = arith.constant 0 : index
    %16 = vector.load %arg2[%c0_20, %c1, %c0_21, %c0_22] : memref<1x8x40x4xbf16, #tpu.memory_space<vmem>>, vector<1x1x32x4xbf16>
    %17 = vector.shape_cast %16 : vector<1x1x32x4xbf16> to vector<32x4xbf16>
    %c0_23 = arith.constant 0 : index
    %c6_24 = arith.constant 6 : index
    %c0_25 = arith.constant 0 : index
    %c0_26 = arith.constant 0 : index
    %18 = vector.load %arg2[%c0_23, %c6_24, %c0_25, %c0_26] : memref<1x8x40x4xbf16, #tpu.memory_space<vmem>>, vector<1x1x32x4xbf16>
    %19 = vector.shape_cast %18 : vector<1x1x32x4xbf16> to vector<32x4xbf16>
    %c0_27 = arith.constant 0 : index
    %c5 = arith.constant 5 : index
    %c0_28 = arith.constant 0 : index
    %c0_29 = arith.constant 0 : index
    %20 = vector.load %arg2[%c0_27, %c5, %c0_28, %c0_29] : memref<1x8x40x4xbf16, #tpu.memory_space<vmem>>, vector<1x1x32x4xbf16>
    %21 = vector.shape_cast %20 : vector<1x1x32x4xbf16> to vector<32x4xbf16>
    %22 = tpu.concatenate %15, %17, %19, %21 in 0 : vector<32x4xbf16>, vector<32x4xbf16>, vector<32x4xbf16>, vector<32x4xbf16> -> vector<128x4xbf16>
    %c1_30 = arith.constant 1 : index
    %c0_31 = arith.constant 0 : index
    %c0_32 = arith.constant 0 : index
    %23 = vector.load %arg3[%c1_30, %c0_31, %c0_32] : memref<9x4x128xbf16, #tpu.memory_space<vmem>>, vector<1x4x128xbf16>
    %24 = vector.shape_cast %23 : vector<1x4x128xbf16> to vector<4x128xbf16>
    %cst_33 = arith.constant dense<0.000000e+00> : vector<128x128xf32>
    %25 = tpu.matmul %22, %24, %cst_33 {dimension_numbers = #tpu.dot_dimension_numbers<[1], [0], [0], [1], [0, 0, 1, 1], [], []>} : vector<128x4xbf16>, vector<4x128xbf16>, vector<128x128xf32> -> vector<128x128xf32>
    %26 = arith.addf %13, %25 : vector<128x128xf32>
    %c0_34 = arith.constant 0 : index
    %c1_35 = arith.constant 1 : index
    %c0_36 = arith.constant 0 : index
    %c0_37 = arith.constant 0 : index
    %27 = vector.load %arg2[%c0_34, %c1_35, %c0_36, %c0_37] : memref<1x8x40x4xbf16, #tpu.memory_space<vmem>>, vector<1x1x32x4xbf16>
    %28 = vector.shape_cast %27 : vector<1x1x32x4xbf16> to vector<32x4xbf16>
    %c0_38 = arith.constant 0 : index
    %c3 = arith.constant 3 : index
    %c0_39 = arith.constant 0 : index
    %c0_40 = arith.constant 0 : index
    %29 = vector.load %arg2[%c0_38, %c3, %c0_39, %c0_40] : memref<1x8x40x4xbf16, #tpu.memory_space<vmem>>, vector<1x1x32x4xbf16>
    %30 = vector.shape_cast %29 : vector<1x1x32x4xbf16> to vector<32x4xbf16>
    %c0_41 = arith.constant 0 : index
    %c5_42 = arith.constant 5 : index
    %c0_43 = arith.constant 0 : index
    %c0_44 = arith.constant 0 : index
    %31 = vector.load %arg2[%c0_41, %c5_42, %c0_43, %c0_44] : memref<1x8x40x4xbf16, #tpu.memory_space<vmem>>, vector<1x1x32x4xbf16>
    %32 = vector.shape_cast %31 : vector<1x1x32x4xbf16> to vector<32x4xbf16>
    %c0_45 = arith.constant 0 : index
    %c7 = arith.constant 7 : index
    %c0_46 = arith.constant 0 : index
    %c0_47 = arith.constant 0 : index
    %33 = vector.load %arg2[%c0_45, %c7, %c0_46, %c0_47] : memref<1x8x40x4xbf16, #tpu.memory_space<vmem>>, vector<1x1x32x4xbf16>
    %34 = vector.shape_cast %33 : vector<1x1x32x4xbf16> to vector<32x4xbf16>
    %35 = tpu.concatenate %28, %30, %32, %34 in 0 : vector<32x4xbf16>, vector<32x4xbf16>, vector<32x4xbf16>, vector<32x4xbf16> -> vector<128x4xbf16>
    %c2_48 = arith.constant 2 : index
    %c0_49 = arith.constant 0 : index
    %c0_50 = arith.constant 0 : index
    %36 = vector.load %arg3[%c2_48, %c0_49, %c0_50] : memref<9x4x128xbf16, #tpu.memory_space<vmem>>, vector<1x4x128xbf16>
    %37 = vector.shape_cast %36 : vector<1x4x128xbf16> to vector<4x128xbf16>
    %cst_51 = arith.constant dense<0.000000e+00> : vector<128x128xf32>
    %38 = tpu.matmul %35, %37, %cst_51 {dimension_numbers = #tpu.dot_dimension_numbers<[1], [0], [0], [1], [0, 0, 1, 1], [], []>} : vector<128x4xbf16>, vector<4x128xbf16>, vector<128x128xf32> -> vector<128x128xf32>
    %39 = arith.addf %26, %38 : vector<128x128xf32>
    %c0_52 = arith.constant 0 : index
    %c4_53 = arith.constant 4 : index
    %c0_54 = arith.constant 0 : index
    %c0_55 = arith.constant 0 : index
    %40 = vector.load %arg2[%c0_52, %c4_53, %c0_54, %c0_55] : memref<1x8x40x4xbf16, #tpu.memory_space<vmem>>, vector<1x1x32x4xbf16>
    %41 = vector.shape_cast %40 : vector<1x1x32x4xbf16> to vector<32x4xbf16>
    %c0_56 = arith.constant 0 : index
    %c6_57 = arith.constant 6 : index
    %c0_58 = arith.constant 0 : index
    %c0_59 = arith.constant 0 : index
    %42 = vector.load %arg2[%c0_56, %c6_57, %c0_58, %c0_59] : memref<1x8x40x4xbf16, #tpu.memory_space<vmem>>, vector<1x1x32x4xbf16>
    %43 = vector.shape_cast %42 : vector<1x1x32x4xbf16> to vector<32x4xbf16>
    %c0_60 = arith.constant 0 : index
    %c0_61 = arith.constant 0 : index
    %c8 = arith.constant 8 : index
    %c0_62 = arith.constant 0 : index
    %44 = vector.load %arg2[%c0_60, %c0_61, %c8, %c0_62] : memref<1x8x40x4xbf16, #tpu.memory_space<vmem>>, vector<1x1x32x4xbf16>
    %45 = vector.shape_cast %44 : vector<1x1x32x4xbf16> to vector<32x4xbf16>
    %c0_63 = arith.constant 0 : index
    %c2_64 = arith.constant 2 : index
    %c8_65 = arith.constant 8 : index
    %c0_66 = arith.constant 0 : index
    %46 = vector.load %arg2[%c0_63, %c2_64, %c8_65, %c0_66] : memref<1x8x40x4xbf16, #tpu.memory_space<vmem>>, vector<1x1x32x4xbf16>
    %47 = vector.shape_cast %46 : vector<1x1x32x4xbf16> to vector<32x4xbf16>
    %48 = tpu.concatenate %41, %43, %45, %47 in 0 : vector<32x4xbf16>, vector<32x4xbf16>, vector<32x4xbf16>, vector<32x4xbf16> -> vector<128x4xbf16>
    %c3_67 = arith.constant 3 : index
    %c0_68 = arith.constant 0 : index
    %c0_69 = arith.constant 0 : index
    %49 = vector.load %arg3[%c3_67, %c0_68, %c0_69] : memref<9x4x128xbf16, #tpu.memory_space<vmem>>, vector<1x4x128xbf16>
    %50 = vector.shape_cast %49 : vector<1x4x128xbf16> to vector<4x128xbf16>
    %cst_70 = arith.constant dense<0.000000e+00> : vector<128x128xf32>
    %51 = tpu.matmul %48, %50, %cst_70 {dimension_numbers = #tpu.dot_dimension_numbers<[1], [0], [0], [1], [0, 0, 1, 1], [], []>} : vector<128x4xbf16>, vector<4x128xbf16>, vector<128x128xf32> -> vector<128x128xf32>
    %52 = arith.addf %39, %51 : vector<128x128xf32>
    %c0_71 = arith.constant 0 : index
    %c6_72 = arith.constant 6 : index
    %c0_73 = arith.constant 0 : index
    %c0_74 = arith.constant 0 : index
    %53 = vector.load %arg2[%c0_71, %c6_72, %c0_73, %c0_74] : memref<1x8x40x4xbf16, #tpu.memory_space<vmem>>, vector<1x1x32x4xbf16>
    %54 = vector.shape_cast %53 : vector<1x1x32x4xbf16> to vector<32x4xbf16>
    %c0_75 = arith.constant 0 : index
    %c5_76 = arith.constant 5 : index
    %c0_77 = arith.constant 0 : index
    %c0_78 = arith.constant 0 : index
    %55 = vector.load %arg2[%c0_75, %c5_76, %c0_77, %c0_78] : memref<1x8x40x4xbf16, #tpu.memory_space<vmem>>, vector<1x1x32x4xbf16>
    %56 = vector.shape_cast %55 : vector<1x1x32x4xbf16> to vector<32x4xbf16>
    %c0_79 = arith.constant 0 : index
    %c2_80 = arith.constant 2 : index
    %c8_81 = arith.constant 8 : index
    %c0_82 = arith.constant 0 : index
    %57 = vector.load %arg2[%c0_79, %c2_80, %c8_81, %c0_82] : memref<1x8x40x4xbf16, #tpu.memory_space<vmem>>, vector<1x1x32x4xbf16>
    %58 = vector.shape_cast %57 : vector<1x1x32x4xbf16> to vector<32x4xbf16>
    %c0_83 = arith.constant 0 : index
    %c1_84 = arith.constant 1 : index
    %c8_85 = arith.constant 8 : index
    %c0_86 = arith.constant 0 : index
    %59 = vector.load %arg2[%c0_83, %c1_84, %c8_85, %c0_86] : memref<1x8x40x4xbf16, #tpu.memory_space<vmem>>, vector<1x1x32x4xbf16>
    %60 = vector.shape_cast %59 : vector<1x1x32x4xbf16> to vector<32x4xbf16>
    %61 = tpu.concatenate %54, %56, %58, %60 in 0 : vector<32x4xbf16>, vector<32x4xbf16>, vector<32x4xbf16>, vector<32x4xbf16> -> vector<128x4xbf16>
    %c4_87 = arith.constant 4 : index
    %c0_88 = arith.constant 0 : index
    %c0_89 = arith.constant 0 : index
    %62 = vector.load %arg3[%c4_87, %c0_88, %c0_89] : memref<9x4x128xbf16, #tpu.memory_space<vmem>>, vector<1x4x128xbf16>
    %63 = vector.shape_cast %62 : vector<1x4x128xbf16> to vector<4x128xbf16>
    %cst_90 = arith.constant dense<0.000000e+00> : vector<128x128xf32>
    %64 = tpu.matmul %61, %63, %cst_90 {dimension_numbers = #tpu.dot_dimension_numbers<[1], [0], [0], [1], [0, 0, 1, 1], [], []>} : vector<128x4xbf16>, vector<4x128xbf16>, vector<128x128xf32> -> vector<128x128xf32>
    %65 = arith.addf %52, %64 : vector<128x128xf32>
    %c0_91 = arith.constant 0 : index
    %c5_92 = arith.constant 5 : index
    %c0_93 = arith.constant 0 : index
    %c0_94 = arith.constant 0 : index
    %66 = vector.load %arg2[%c0_91, %c5_92, %c0_93, %c0_94] : memref<1x8x40x4xbf16, #tpu.memory_space<vmem>>, vector<1x1x32x4xbf16>
    %67 = vector.shape_cast %66 : vector<1x1x32x4xbf16> to vector<32x4xbf16>
    %c0_95 = arith.constant 0 : index
    %c7_96 = arith.constant 7 : index
    %c0_97 = arith.constant 0 : index
    %c0_98 = arith.constant 0 : index
    %68 = vector.load %arg2[%c0_95, %c7_96, %c0_97, %c0_98] : memref<1x8x40x4xbf16, #tpu.memory_space<vmem>>, vector<1x1x32x4xbf16>
    %69 = vector.shape_cast %68 : vector<1x1x32x4xbf16> to vector<32x4xbf16>
    %c0_99 = arith.constant 0 : index
    %c1_100 = arith.constant 1 : index
    %c8_101 = arith.constant 8 : index
    %c0_102 = arith.constant 0 : index
    %70 = vector.load %arg2[%c0_99, %c1_100, %c8_101, %c0_102] : memref<1x8x40x4xbf16, #tpu.memory_space<vmem>>, vector<1x1x32x4xbf16>
    %71 = vector.shape_cast %70 : vector<1x1x32x4xbf16> to vector<32x4xbf16>
    %c0_103 = arith.constant 0 : index
    %c3_104 = arith.constant 3 : index
    %c8_105 = arith.constant 8 : index
    %c0_106 = arith.constant 0 : index
    %72 = vector.load %arg2[%c0_103, %c3_104, %c8_105, %c0_106] : memref<1x8x40x4xbf16, #tpu.memory_space<vmem>>, vector<1x1x32x4xbf16>
    %73 = vector.shape_cast %72 : vector<1x1x32x4xbf16> to vector<32x4xbf16>
    %74 = tpu.concatenate %67, %69, %71, %73 in 0 : vector<32x4xbf16>, vector<32x4xbf16>, vector<32x4xbf16>, vector<32x4xbf16> -> vector<128x4xbf16>
    %c5_107 = arith.constant 5 : index
    %c0_108 = arith.constant 0 : index
    %c0_109 = arith.constant 0 : index
    %75 = vector.load %arg3[%c5_107, %c0_108, %c0_109] : memref<9x4x128xbf16, #tpu.memory_space<vmem>>, vector<1x4x128xbf16>
    %76 = vector.shape_cast %75 : vector<1x4x128xbf16> to vector<4x128xbf16>
    %cst_110 = arith.constant dense<0.000000e+00> : vector<128x128xf32>
    %77 = tpu.matmul %74, %76, %cst_110 {dimension_numbers = #tpu.dot_dimension_numbers<[1], [0], [0], [1], [0, 0, 1, 1], [], []>} : vector<128x4xbf16>, vector<4x128xbf16>, vector<128x128xf32> -> vector<128x128xf32>
    %78 = arith.addf %65, %77 : vector<128x128xf32>
    %c0_111 = arith.constant 0 : index
    %c0_112 = arith.constant 0 : index
    %c8_113 = arith.constant 8 : index
    %c0_114 = arith.constant 0 : index
    %79 = vector.load %arg2[%c0_111, %c0_112, %c8_113, %c0_114] : memref<1x8x40x4xbf16, #tpu.memory_space<vmem>>, vector<1x1x32x4xbf16>
    %80 = vector.shape_cast %79 : vector<1x1x32x4xbf16> to vector<32x4xbf16>
    %c0_115 = arith.constant 0 : index
    %c2_116 = arith.constant 2 : index
    %c8_117 = arith.constant 8 : index
    %c0_118 = arith.constant 0 : index
    %81 = vector.load %arg2[%c0_115, %c2_116, %c8_117, %c0_118] : memref<1x8x40x4xbf16, #tpu.memory_space<vmem>>, vector<1x1x32x4xbf16>
    %82 = vector.shape_cast %81 : vector<1x1x32x4xbf16> to vector<32x4xbf16>
    %c0_119 = arith.constant 0 : index
    %c4_120 = arith.constant 4 : index
    %c8_121 = arith.constant 8 : index
    %c0_122 = arith.constant 0 : index
    %83 = vector.load %arg2[%c0_119, %c4_120, %c8_121, %c0_122] : memref<1x8x40x4xbf16, #tpu.memory_space<vmem>>, vector<1x1x32x4xbf16>
    %84 = vector.shape_cast %83 : vector<1x1x32x4xbf16> to vector<32x4xbf16>
    %c0_123 = arith.constant 0 : index
    %c6_124 = arith.constant 6 : index
    %c8_125 = arith.constant 8 : index
    %c0_126 = arith.constant 0 : index
    %85 = vector.load %arg2[%c0_123, %c6_124, %c8_125, %c0_126] : memref<1x8x40x4xbf16, #tpu.memory_space<vmem>>, vector<1x1x32x4xbf16>
    %86 = vector.shape_cast %85 : vector<1x1x32x4xbf16> to vector<32x4xbf16>
    %87 = tpu.concatenate %80, %82, %84, %86 in 0 : vector<32x4xbf16>, vector<32x4xbf16>, vector<32x4xbf16>, vector<32x4xbf16> -> vector<128x4xbf16>
    %c6_127 = arith.constant 6 : index
    %c0_128 = arith.constant 0 : index
    %c0_129 = arith.constant 0 : index
    %88 = vector.load %arg3[%c6_127, %c0_128, %c0_129] : memref<9x4x128xbf16, #tpu.memory_space<vmem>>, vector<1x4x128xbf16>
    %89 = vector.shape_cast %88 : vector<1x4x128xbf16> to vector<4x128xbf16>
    %cst_130 = arith.constant dense<0.000000e+00> : vector<128x128xf32>
    %90 = tpu.matmul %87, %89, %cst_130 {dimension_numbers = #tpu.dot_dimension_numbers<[1], [0], [0], [1], [0, 0, 1, 1], [], []>} : vector<128x4xbf16>, vector<4x128xbf16>, vector<128x128xf32> -> vector<128x128xf32>
    %91 = arith.addf %78, %90 : vector<128x128xf32>
    %c0_131 = arith.constant 0 : index
    %c2_132 = arith.constant 2 : index
    %c8_133 = arith.constant 8 : index
    %c0_134 = arith.constant 0 : index
    %92 = vector.load %arg2[%c0_131, %c2_132, %c8_133, %c0_134] : memref<1x8x40x4xbf16, #tpu.memory_space<vmem>>, vector<1x1x32x4xbf16>
    %93 = vector.shape_cast %92 : vector<1x1x32x4xbf16> to vector<32x4xbf16>
    %c0_135 = arith.constant 0 : index
    %c1_136 = arith.constant 1 : index
    %c8_137 = arith.constant 8 : index
    %c0_138 = arith.constant 0 : index
    %94 = vector.load %arg2[%c0_135, %c1_136, %c8_137, %c0_138] : memref<1x8x40x4xbf16, #tpu.memory_space<vmem>>, vector<1x1x32x4xbf16>
    %95 = vector.shape_cast %94 : vector<1x1x32x4xbf16> to vector<32x4xbf16>
    %c0_139 = arith.constant 0 : index
    %c6_140 = arith.constant 6 : index
    %c8_141 = arith.constant 8 : index
    %c0_142 = arith.constant 0 : index
    %96 = vector.load %arg2[%c0_139, %c6_140, %c8_141, %c0_142] : memref<1x8x40x4xbf16, #tpu.memory_space<vmem>>, vector<1x1x32x4xbf16>
    %97 = vector.shape_cast %96 : vector<1x1x32x4xbf16> to vector<32x4xbf16>
    %c0_143 = arith.constant 0 : index
    %c5_144 = arith.constant 5 : index
    %c8_145 = arith.constant 8 : index
    %c0_146 = arith.constant 0 : index
    %98 = vector.load %arg2[%c0_143, %c5_144, %c8_145, %c0_146] : memref<1x8x40x4xbf16, #tpu.memory_space<vmem>>, vector<1x1x32x4xbf16>
    %99 = vector.shape_cast %98 : vector<1x1x32x4xbf16> to vector<32x4xbf16>
    %100 = tpu.concatenate %93, %95, %97, %99 in 0 : vector<32x4xbf16>, vector<32x4xbf16>, vector<32x4xbf16>, vector<32x4xbf16> -> vector<128x4xbf16>
    %c7_147 = arith.constant 7 : index
    %c0_148 = arith.constant 0 : index
    %c0_149 = arith.constant 0 : index
    %101 = vector.load %arg3[%c7_147, %c0_148, %c0_149] : memref<9x4x128xbf16, #tpu.memory_space<vmem>>, vector<1x4x128xbf16>
    %102 = vector.shape_cast %101 : vector<1x4x128xbf16> to vector<4x128xbf16>
    %cst_150 = arith.constant dense<0.000000e+00> : vector<128x128xf32>
    %103 = tpu.matmul %100, %102, %cst_150 {dimension_numbers = #tpu.dot_dimension_numbers<[1], [0], [0], [1], [0, 0, 1, 1], [], []>} : vector<128x4xbf16>, vector<4x128xbf16>, vector<128x128xf32> -> vector<128x128xf32>
    %104 = arith.addf %91, %103 : vector<128x128xf32>
    %c0_151 = arith.constant 0 : index
    %c1_152 = arith.constant 1 : index
    %c8_153 = arith.constant 8 : index
    %c0_154 = arith.constant 0 : index
    %105 = vector.load %arg2[%c0_151, %c1_152, %c8_153, %c0_154] : memref<1x8x40x4xbf16, #tpu.memory_space<vmem>>, vector<1x1x32x4xbf16>
    %106 = vector.shape_cast %105 : vector<1x1x32x4xbf16> to vector<32x4xbf16>
    %c0_155 = arith.constant 0 : index
    %c3_156 = arith.constant 3 : index
    %c8_157 = arith.constant 8 : index
    %c0_158 = arith.constant 0 : index
    %107 = vector.load %arg2[%c0_155, %c3_156, %c8_157, %c0_158] : memref<1x8x40x4xbf16, #tpu.memory_space<vmem>>, vector<1x1x32x4xbf16>
    %108 = vector.shape_cast %107 : vector<1x1x32x4xbf16> to vector<32x4xbf16>
    %c0_159 = arith.constant 0 : index
    %c5_160 = arith.constant 5 : index
    %c8_161 = arith.constant 8 : index
    %c0_162 = arith.constant 0 : index
    %109 = vector.load %arg2[%c0_159, %c5_160, %c8_161, %c0_162] : memref<1x8x40x4xbf16, #tpu.memory_space<vmem>>, vector<1x1x32x4xbf16>
    %110 = vector.shape_cast %109 : vector<1x1x32x4xbf16> to vector<32x4xbf16>
    %c0_163 = arith.constant 0 : index
    %c7_164 = arith.constant 7 : index
    %c8_165 = arith.constant 8 : index
    %c0_166 = arith.constant 0 : index
    %111 = vector.load %arg2[%c0_163, %c7_164, %c8_165, %c0_166] : memref<1x8x40x4xbf16, #tpu.memory_space<vmem>>, vector<1x1x32x4xbf16>
    %112 = vector.shape_cast %111 : vector<1x1x32x4xbf16> to vector<32x4xbf16>
    %113 = tpu.concatenate %106, %108, %110, %112 in 0 : vector<32x4xbf16>, vector<32x4xbf16>, vector<32x4xbf16>, vector<32x4xbf16> -> vector<128x4xbf16>
    %c8_167 = arith.constant 8 : index
    %c0_168 = arith.constant 0 : index
    %c0_169 = arith.constant 0 : index
    %114 = vector.load %arg3[%c8_167, %c0_168, %c0_169] : memref<9x4x128xbf16, #tpu.memory_space<vmem>>, vector<1x4x128xbf16>
    %115 = vector.shape_cast %114 : vector<1x4x128xbf16> to vector<4x128xbf16>
    %cst_170 = arith.constant dense<0.000000e+00> : vector<128x128xf32>
    %116 = tpu.matmul %113, %115, %cst_170 {dimension_numbers = #tpu.dot_dimension_numbers<[1], [0], [0], [1], [0, 0, 1, 1], [], []>} : vector<128x4xbf16>, vector<4x128xbf16>, vector<128x128xf32> -> vector<128x128xf32>
    %117 = arith.addf %104, %116 : vector<128x128xf32>
    %c0_171 = arith.constant 0 : index
    %c0_172 = arith.constant 0 : index
    %118 = vector.load %arg4[%c0_171, %c0_172] : memref<1x128xf32, #tpu.memory_space<vmem>>, vector<1x128xf32>
    %119 = vector.broadcast %118 : vector<1x128xf32> to vector<128x128xf32>
    %120 = arith.mulf %117, %119 : vector<128x128xf32>
    %c0_173 = arith.constant 0 : index
    %c0_174 = arith.constant 0 : index
    %121 = vector.load %arg5[%c0_173, %c0_174] : memref<1x128xf32, #tpu.memory_space<vmem>>, vector<1x128xf32>
    %122 = vector.broadcast %121 : vector<1x128xf32> to vector<128x128xf32>
    %123 = arith.addf %120, %122 : vector<128x128xf32>
    %cst_175 = arith.constant 0.000000e+00 : f32
    %124 = vector.broadcast %cst_175 : f32 to vector<128x128xf32>
    %125 = arith.cmpf ogt, %123, %124 : vector<128x128xf32>
    %cst_176 = arith.constant 0.00999999977 : f32
    %126 = vector.broadcast %cst_176 : f32 to vector<128x128xf32>
    %127 = arith.mulf %126, %123 : vector<128x128xf32>
    %128 = arith.select %125, %123, %127 : vector<128x128xi1>, vector<128x128xf32>
    %129 = vector.extract_strided_slice %128 {offsets = [0, 0], sizes = [32, 128], strides = [1, 1]} : vector<128x128xf32> to vector<32x128xf32>
    %130 = vector.extract_strided_slice %128 {offsets = [32, 0], sizes = [32, 128], strides = [1, 1]} : vector<128x128xf32> to vector<32x128xf32>
    %131 = arith.maximumf %129, %130 : vector<32x128xf32>
    %132 = vector.extract_strided_slice %128 {offsets = [64, 0], sizes = [32, 128], strides = [1, 1]} : vector<128x128xf32> to vector<32x128xf32>
    %133 = vector.extract_strided_slice %128 {offsets = [96, 0], sizes = [32, 128], strides = [1, 1]} : vector<128x128xf32> to vector<32x128xf32>
    %134 = arith.maximumf %132, %133 : vector<32x128xf32>
    %135 = arith.maximumf %131, %134 : vector<32x128xf32>
    %c0_177 = arith.constant 0 : index
    %c0_178 = arith.constant 0 : index
    %c0_179 = arith.constant 0 : index
    %136 = vector.load %arg6[%c0_177, %c0_178, %c0_179] : memref<1x32x128xf32, #tpu.memory_space<vmem>>, vector<1x32x128xf32>
    %137 = vector.shape_cast %136 : vector<1x32x128xf32> to vector<32x128xf32>
    %138 = vector.shape_cast %135 : vector<32x128xf32> to vector<1x32x128xf32>
    tpu.vector_store %arg6[%c0_177, %c0_178, %c0_179], %138 {strides = array<i32>} : memref<1x32x128xf32, #tpu.memory_space<vmem>>, vector<1x32x128xf32>,
    return
  }
  func.func @transform_0(%arg0: i32, %arg1: i32) -> (i32, i32, i32, i32) {
    %c2_i32 = arith.constant 2 : i32
    %0 = arith.muli %arg0, %c2_i32 : i32
    %1 = arith.addi %0, %arg1 : i32
    %c0_i32 = arith.constant 0 : i32
    %c0_i32_0 = arith.constant 0 : i32
    %c0_i32_1 = arith.constant 0 : i32
    %c0_i32_2 = arith.constant 0 : i32
    return %1, %c0_i32, %c0_i32_0, %c0_i32_1 : i32, i32, i32, i32
  }
  func.func @transform_1(%arg0: i32, %arg1: i32) -> (i32, i32, i32) {
    %c0_i32 = arith.constant 0 : i32
    %c0_i32_0 = arith.constant 0 : i32
    %c0_i32_1 = arith.constant 0 : i32
    %c0_i32_2 = arith.constant 0 : i32
    return %c0_i32, %c0_i32_0, %c0_i32_1 : i32, i32, i32
  }
  func.func @transform_2(%arg0: i32, %arg1: i32) -> (i32, i32) {
    %c0_i32 = arith.constant 0 : i32
    %c0_i32_0 = arith.constant 0 : i32
    %c0_i32_1 = arith.constant 0 : i32
    return %c0_i32, %c0_i32_0 : i32, i32
  }
  func.func @transform_3(%arg0: i32, %arg1: i32) -> (i32, i32) {
    %c0_i32 = arith.constant 0 : i32
    %c0_i32_0 = arith.constant 0 : i32
    %c0_i32_1 = arith.constant 0 : i32
    return %c0_i32, %c0_i32_0 : i32, i32
  }
  func.func @transform_4(%arg0: i32, %arg1: i32) -> (i32, i32, i32) {
    %c0_i32 = arith.constant 0 : i32
    %c0_i32_0 = arith.constant 0 : i32
    return %arg0, %arg1, %c0_i32 : i32, i32, i32
  }
}

</mosaic_0001>

<bundles_post_ra>
// kernel: basic_conv_block.3
= control target key start
LH: loop header
LB: loop body
LE: loop exit
PB: predicated region body
PF: predicated region fallthrough
CT: control target
= control target key end

     0   :  { %s2365_s15 = smov 0   ;;  %s2367_s16 = smov 0   ;;  %s2812_s0 = inlined_call_operand.vmem [shape: bf16[4,8,40,4], index: 0, kind: input, shape index: {}]   ;;  %s2813_s1 = inlined_call_operand.vmem [shape: bf16[9,4,128], index: 1, kind: input, shape index: {}]   ;;  %s2814_s2 = inlined_call_operand.vmem [shape: f32[1,128], index: 2, kind: input, shape index: {}]   ;;  %s2815_s3 = inlined_call_operand.vmem [shape: f32[1,128], index: 3, kind: input, shape index: {}]   ;;  %s2816_s4 = inlined_call_operand.vmem [shape: f32[2,64,128], index: 4, kind: output, shape index: {}]  }
   0x1   :  { %s2369_s17 = smov 0   ;;  %s2371_s18 = smov 0  }
   0x2   :  { %s2373_s19 = smov 0  }
   0x3 LB: > { %s23_s20 = sadd.s32 1, %s2330_s17  ;;  %s26_s21 = sadd.s32 1, %s2334_s18  ;;  %s2338_s19 = sphi %s2373_s19, %s14_s19   ;;  %s2334_s18 = sphi %s2371_s18, %s2827_s18   ;;  %s2330_s17 = sphi %s2369_s17, %s2826_s17   ;;  %s2326_s16 = sphi %s2367_s16, %s2825_s16   ;;  %s2322_s15 = sphi %s2365_s15, %s2824_s15  }
   0x4   : > { %p24_p0 = scmp.ge.s32.totalorder %s23_s20, 2  ;;  %p1794_p1 = scmp.ge.s32.totalorder %s2338_s19, 1 }
   0x5   : > { %p184_p2 = scmp.lt.s32.totalorder %s2338_s19, 5 }
   0x6   : > { %s2829_s20 = smov (%p24_p0, %s23_s20), 0  ;;  %s2831_s21 = smov (!%p24_p0, %s26_s21), %s2334_s18 }
   0x7   : > { %p185_p3 = pnand %p1794_p1, %p184_p2  ;;  %p28_p4 = scmp.ge.s32.totalorder %s2831_s21, 2 }
   0x9   : > { %s2833_s21 = smov (%p28_p4, %s2831_s21), 0  ;;  %188 = sbr.rel (%p185_p3) target bundleno = 376 (0x178), region = 36 }
   0xe   : > { %v1832_v0 = vld [vmem:[%s2813_s1 + $0x2] sm:$0x3]  ;;  %vm353_vm0 = vcmask 1041408   ;;  %s1795_s24 = sshll.u32 %s2326_s16, 1  ;;  %v295_v2 = vld [vmem:[%s2813_s1] sm:$0x3] }
   0xf   : > { %2218 = vmatprep.subr.msk.bf16.mxu1 %vm353_vm0, %v1832_v0  ;;  %2217 = vmatprep.subr.msk.bf16.mxu0 %vm353_vm0, %v1832_v0  ;;  %v355_v1 = vsel %vm353_vm0, %v1832_v0, 0  ;;  %s217_s25 = sadd.s32 %s2322_s15, %s1795_s24  ;;  %v1861_v3 = vld [vmem:[%s2813_s1 + $0x4] sm:$0x3]  ;;  %vm328_vm1 = vcmask 31744   ;;  %v1878_v8 = vld [vmem:[%s2813_s1 + $0x6] sm:$0x3] }
  0x10   : > { %2216 = vmatpush3.bf16.msra.mxu1 %v355_v1  ;;  %2054 = vmatpush3.bf16.msra.mxu0 %v355_v1  ;;  %p218_p5 = scmp.lt.s32.totalorder %s217_s25, 3  ;;  %v611_v7 = vsel %vm353_vm0, %v1861_v3, 0  ;;  %v467_v10 = vsel %vm353_vm0, %v295_v2, 0  ;;  %v1893_v11 = vld [vmem:[%s2813_s1 + $0x8] sm:$0x3]  ;;  %v769_v19 = vsel %vm353_vm0, %v1878_v8, 0 }
  0x11   : > { %2219 = vmatprep.subr.msk.bf16.mxu1 %vm353_vm0, %v295_v2  ;;  %2220 = vmatprep.subr.msk.bf16.mxu0 %vm353_vm0, %v1861_v3  ;;  %v907_v18 = vsel %vm353_vm0, %v1893_v11, 0  ;;  %v1908_v21 = vld [vmem:[%s2813_s1 + $0xa] sm:$0x3]  ;;  %v1929_v22 = vld [vmem:[%s2813_s1 + $0xc] sm:$0x3]  ;;  %s1797_s5 = sshll.u32 %s2322_s15, 2 }
  0x12   : > { %s2835_s25 = smov (!%p218_p5, %s217_s25), 3  ;;  %v1203_v28 = vsel %vm353_vm0, %v1929_v22, 0  ;;  %v1045_v29 = vsel %vm353_vm0, %v1908_v21, 0  ;;  %v1944_v30 = vld [vmem:[%s2813_s1 + $0xe] sm:$0x3]  ;;  %p226_p6 = scmp.lt.s32.totalorder %s2326_s16, 1 }
  0x13   : > { %s2227_s30 = smul.u32 160, %s2835_s25  ;;  %v1959_v31 = vld [vmem:[%s2813_s1 + $0x10] sm:$0x3]  ;;  %v1341_v39 = vsel %vm353_vm0, %v1944_v30, 0  ;;  %p2746_p7 = scmp.lt.s32.totalorder %s1797_s5, 7 }
  0x14   : > { %v1479_v38 = vsel %vm353_vm0, %v1959_v31, 0  ;;  %s2837_s16 = smov (!%p226_p6, %s2326_s16), 1 }
  0x15   : > { %s2418_s7 = scalar_lea.vmem %s2812_s0, %s2227_s30  ;;  %s2839_s5 = smov (!%p2746_p7, %s1797_s5), 7 }
  0x16   : > { %v2268_v4 = vld [vmem:[%s2418_s7 + $0x28] sm:$0xff]   ;;  %v2422_v5 = vld [vmem:[%s2418_s7 + $0x78] sm:$0xff]   ;;  %v2270_v6 = vld [vmem:[%s2418_s7 + $0x30] sm:$0xff]  }
  0x17   : > { %2055 = vmatprep.mubr.msk.bf16.mxu0 %vm328_vm1, %v2268_v4  ;;  %2063 = vmatprep.mubr.msk.bf16.mxu1 %vm328_vm1, %v2422_v5  ;;  %v2433_v9 = vld [vmem:[%s2418_s7 + $0x80] sm:$0xff]   ;;  %v2272_v12 = vld [vmem:[%s2418_s7 + $0x14] sm:$0xff]   ;;  %v2453_v15 = vld [vmem:[%s2418_s7 + $0x6c] sm:$0xff]  }
  0x18   : > { %2056 = vmatmul.mubr.msk.bf16.vlgmr.msra.gmra.mxu0 %vm328_vm1, %v2270_v6  ;;  %2064 = vmatmul.mubr.msk.bf16.vlgmr.msra.gmra.mxu1 %vm328_vm1, %v2433_v9  ;;  %v2444_v13 = vld [vmem:[%s2418_s7 + $0x64] sm:$0xff]   ;;  %v2274_v14 = vld [vmem:[%s2418_s7 + $0x1c] sm:$0xff]   ;;  %v2280_v24 = vld [vmem:[%s2418_s7 + $0x50] sm:$0xff]  }
  0x19   : > { %2090 = vmatpush3.bf16.msra.mxu0 %v611_v7  ;;  %2072 = vmatpush3.bf16.msra.mxu1 %v467_v10  ;;  %v2276_v16 = vld [vmem:[%s2418_s7] sm:$0xff]   ;;  %v2277_v17 = vld [vmem:[%s2418_s7 + $0x8] sm:$0xff]   ;;  %v2281_v25 = vld [vmem:[%s2418_s7 + $0x58] sm:$0xff]  }
  0x1a   : > { %2059 = vmatprep.mubr.msk.bf16.mxu0 %vm328_vm1, %v2272_v12  ;;  %2067 = vmatprep.mubr.msk.bf16.mxu1 %vm328_vm1, %v2444_v13  ;;  %v2278_v20 = vld [vmem:[%s2418_s7 + $0x3c] sm:$0xff]   ;;  %v2279_v23 = vld [vmem:[%s2418_s7 + $0x44] sm:$0xff]   ;;  %v2282_v26 = vld [vmem:[%s2418_s7 + $0x8c] sm:$0xff]  }
  0x1b   : > { %2221 = vmatprep.subr.msk.bf16.mxu1 %vm353_vm0, %v1878_v8  ;;  %2222 = vmatprep.subr.msk.bf16.mxu0 %vm353_vm0, %v1893_v11  ;;  %v2283_v27 = vld [vmem:[%s2418_s7 + $0x94] sm:$0xff]   ;;  %v2285_v32 = vld [vmem:[%s2418_s7 + $0x2c] sm:$0xff]   ;;  %v2284_v33 = vld [vmem:[%s2418_s7 + $0x4] sm:$0xff]  }
  0x1c   : > { %v2287_v34 = vld [vmem:[%s2418_s7 + $0x34] sm:$0xff]   ;;  %v2286_v35 = vld [vmem:[%s2418_s7 + $0xc] sm:$0xff]   ;;  %v2289_v37 = vld [vmem:[%s2418_s7 + $0x20] sm:$0xff]  }
  0x1d   : > { %v2288_v36 = vld [vmem:[%s2418_s7 + $0x18] sm:$0xff]   ;;  %v2292_v43 = vld [vmem:[%s2418_s7 + $0x40] sm:$0xff]   ;;  %v2294_v45 = vld [vmem:[%s2418_s7 + $0x48] sm:$0xff]  }
  0x1e   : > { %v2290_v40 = vld [vmem:[%s2418_s7 + $0x54] sm:$0xff]   ;;  %v2291_v41 = vld [vmem:[%s2418_s7 + $0x5c] sm:$0xff]   ;;  %v2295_v44 = vld [vmem:[%s2418_s7 + $0x84] sm:$0xff]  }
  0x1f   : > { %v2293_v42 = vld [vmem:[%s2418_s7 + $0x7c] sm:$0xff]   ;;  %v2296_v46 = vld [vmem:[%s2418_s7 + $0x68] sm:$0xff]   ;;  %v2297_v47 = vld [vmem:[%s2418_s7 + $0x70] sm:$0xff]  }
  0x20   : > { %2060 = vmatmul.mubr.msk.bf16.gmra.mxu0 %vm328_vm1, %v2274_v14  ;;  %2068 = vmatmul.mubr.msk.bf16.gmra.mxu1 %vm328_vm1, %v2453_v15  ;;  %v2298_v48 = vld [vmem:[%s2418_s7 + $0x90] sm:$0xff]   ;;  %v2299_v49 = vld [vmem:[%s2418_s7 + $0x98] sm:$0xff]   ;;  %s1798_s7 = sshll.u32 %s2837_s16, 3 }
  0x21   : > { %2091 = vmatprep.mubr.msk.bf16.mxu0 %vm328_vm1, %v2272_v12  ;;  %2073 = vmatprep.mubr.msk.bf16.mxu1 %vm328_vm1, %v2276_v16  ;;  %s231_s15 = sadd.s32 %s1798_s7, %s2839_s5 }
  0x22   : > { %s1799_s16 = sshll.u32 %s231_s15, 3 }
  0x23   : > { %s233_s10 = scalar_lea.vmem %s2816_s4, %s1799_s16 }
  0x28   : > { %2092 = vmatmul.mubr.msk.bf16.vlgmr.msra.gmra.mxu0 %vm328_vm1, %v2274_v14  ;;  %2074 = vmatmul.mubr.msk.bf16.vlgmr.msra.gmra.mxu1 %vm328_vm1, %v2277_v17 }
  0x29   : > { %2126 = vmatpush3.bf16.msra.mxu0 %v907_v18  ;;  %2108 = vmatpush3.bf16.msra.mxu1 %v769_v19 }
  0x2a   : > { %2077 = vmatprep.mubr.msk.bf16.mxu1 %vm328_vm1, %v2268_v4  ;;  %2095 = vmatprep.mubr.msk.bf16.mxu0 %vm328_vm1, %v2278_v20 }
  0x2b   : > { %2223 = vmatprep.subr.msk.bf16.mxu1 %vm353_vm0, %v1908_v21  ;;  %2224 = vmatprep.subr.msk.bf16.mxu0 %vm353_vm0, %v1929_v22 }
  0x30   : > { %2096 = vmatmul.mubr.msk.bf16.gmra.mxu0 %vm328_vm1, %v2279_v23  ;;  %2078 = vmatmul.mubr.msk.bf16.gmra.mxu1 %vm328_vm1, %v2270_v6 }
  0x31   : > { %2099 = vmatprep.mubr.msk.bf16.mxu0 %vm328_vm1, %v2444_v13  ;;  %2081 = vmatprep.mubr.msk.bf16.mxu1 %vm328_vm1, %v2280_v24 }
  0x38   : > { %2100 = vmatmul.mubr.msk.bf16.gmra.mxu0 %vm328_vm1, %v2453_v15  ;;  %2082 = vmatmul.mubr.msk.bf16.gmra.mxu1 %vm328_vm1, %v2281_v25 }
  0x39   : > { %2103 = vmatprep.mubr.msk.bf16.mxu0 %vm328_vm1, %v2282_v26  ;;  %2085 = vmatprep.mubr.msk.bf16.mxu1 %vm328_vm1, %v2422_v5 }
  0x40   : > { %2104 = vmatmul.mubr.msk.bf16.gmra.mxu0 %vm328_vm1, %v2283_v27  ;;  %2086 = vmatmul.mubr.msk.bf16.gmra.mxu1 %vm328_vm1, %v2433_v9 }
  0x41   : > { %2127 = vmatprep.mubr.msk.bf16.mxu0 %vm328_vm1, %v2422_v5  ;;  %2109 = vmatprep.mubr.msk.bf16.mxu1 %vm328_vm1, %v2280_v24 }
  0x48   : > { %2128 = vmatmul.mubr.msk.bf16.vlgmr.msra.gmra.mxu0 %vm328_vm1, %v2433_v9  ;;  %2110 = vmatmul.mubr.msk.bf16.vlgmr.msra.gmra.mxu1 %vm328_vm1, %v2281_v25 }
  0x49   : > { %2162 = vmatpush3.bf16.msra.mxu0 %v1203_v28  ;;  %2144 = vmatpush3.bf16.msra.mxu1 %v1045_v29 }
  0x4a   : > { %2113 = vmatprep.mubr.msk.bf16.mxu1 %vm328_vm1, %v2422_v5  ;;  %2131 = vmatprep.mubr.msk.bf16.mxu0 %vm328_vm1, %v2444_v13 }
  0x4b   : > { %2225 = vmatprep.subr.msk.bf16.mxu1 %vm353_vm0, %v1944_v30  ;;  %2226 = vmatprep.subr.msk.bf16.mxu0 %vm353_vm0, %v1959_v31 }
  0x50   : > { %2132 = vmatmul.mubr.msk.bf16.gmra.mxu0 %vm328_vm1, %v2453_v15  ;;  %2114 = vmatmul.mubr.msk.bf16.gmra.mxu1 %vm328_vm1, %v2433_v9 }
  0x51   : > { %2135 = vmatprep.mubr.msk.bf16.mxu0 %vm328_vm1, %v2285_v32  ;;  %2117 = vmatprep.mubr.msk.bf16.mxu1 %vm328_vm1, %v2284_v33 }
  0x58   : > { %2136 = vmatmul.mubr.msk.bf16.gmra.mxu0 %vm328_vm1, %v2287_v34  ;;  %2118 = vmatmul.mubr.msk.bf16.gmra.mxu1 %vm328_vm1, %v2286_v35 }
  0x59   : > { %2139 = vmatprep.mubr.msk.bf16.mxu0 %vm328_vm1, %v2288_v36  ;;  %2121 = vmatprep.mubr.msk.bf16.mxu1 %vm328_vm1, %v2285_v32 }
  0x60   : > { %2140 = vmatmul.mubr.msk.bf16.gmra.mxu0 %vm328_vm1, %v2289_v37  ;;  %2122 = vmatmul.mubr.msk.bf16.gmra.mxu1 %vm328_vm1, %v2287_v34 }
  0x61   : > { %2163 = vmatprep.mubr.msk.bf16.mxu0 %vm328_vm1, %v2284_v33  ;;  %2145 = vmatprep.mubr.msk.bf16.mxu1 %vm328_vm1, %v2444_v13 }
  0x68   : > { %2164 = vmatmul.mubr.msk.bf16.vlgmr.msra.gmra.mxu0 %vm328_vm1, %v2286_v35  ;;  %2146 = vmatmul.mubr.msk.bf16.vlgmr.msra.gmra.mxu1 %vm328_vm1, %v2453_v15 }
  0x69   : > { %2198 = vmatpush3.bf16.msra.mxu0 %v1479_v38  ;;  %2180 = vmatpush3.bf16.msra.mxu1 %v1341_v39 }
  0x6a   : > { %2149 = vmatprep.mubr.msk.bf16.mxu1 %vm328_vm1, %v2282_v26  ;;  %2167 = vmatprep.mubr.msk.bf16.mxu0 %vm328_vm1, %v2285_v32 }
  0x70   : > { %2168 = vmatmul.mubr.msk.bf16.gmra.mxu0 %vm328_vm1, %v2287_v34  ;;  %2150 = vmatmul.mubr.msk.bf16.gmra.mxu1 %vm328_vm1, %v2283_v27 }
  0x71   : > { %2171 = vmatprep.mubr.msk.bf16.mxu0 %vm328_vm1, %v2290_v40  ;;  %2153 = vmatprep.mubr.msk.bf16.mxu1 %vm328_vm1, %v2288_v36 }
  0x78   : > { %2172 = vmatmul.mubr.msk.bf16.gmra.mxu0 %vm328_vm1, %v2291_v41  ;;  %2154 = vmatmul.mubr.msk.bf16.gmra.mxu1 %vm328_vm1, %v2289_v37 }
  0x79   : > { %2175 = vmatprep.mubr.msk.bf16.mxu0 %vm328_vm1, %v2293_v42  ;;  %2157 = vmatprep.mubr.msk.bf16.mxu1 %vm328_vm1, %v2292_v43 }
  0x80   : > { %2176 = vmatmul.mubr.msk.bf16.gmra.mxu0 %vm328_vm1, %v2295_v44  ;;  %2158 = vmatmul.mubr.msk.bf16.gmra.mxu1 %vm328_vm1, %v2294_v45 }
  0x81   : > { %2199 = vmatprep.mubr.msk.bf16.mxu0 %vm328_vm1, %v2288_v36  ;;  %2181 = vmatprep.mubr.msk.bf16.mxu1 %vm328_vm1, %v2285_v32 }
  0x88   : > { %2200 = vmatmul.mubr.msk.bf16.vlgmr.msra.gmra.mxu0 %vm328_vm1, %v2289_v37  ;;  %2182 = vmatmul.mubr.msk.bf16.vlgmr.msra.gmra.mxu1 %vm328_vm1, %v2287_v34 }
  0x89   : > { %2203 = vmatprep.mubr.msk.bf16.mxu0 %vm328_vm1, %v2292_v43  ;;  %2185 = vmatprep.mubr.msk.bf16.mxu1 %vm328_vm1, %v2288_v36 }
  0x90   : > { %2204 = vmatmul.mubr.msk.bf16.gmra.mxu0 %vm328_vm1, %v2294_v45  ;;  %2186 = vmatmul.mubr.msk.bf16.gmra.mxu1 %vm328_vm1, %v2289_v37 }
  0x91   : > { %2207 = vmatprep.mubr.msk.bf16.mxu0 %vm328_vm1, %v2296_v46  ;;  %2189 = vmatprep.mubr.msk.bf16.mxu1 %vm328_vm1, %v2293_v42 }
  0x98   : > { %2208 = vmatmul.mubr.msk.bf16.gmra.mxu0 %vm328_vm1, %v2297_v47  ;;  %2190 = vmatmul.mubr.msk.bf16.gmra.mxu1 %vm328_vm1, %v2295_v44 }
  0x99   : > { %2211 = vmatprep.mubr.msk.bf16.mxu0 %vm328_vm1, %v2298_v48  ;;  %2193 = vmatprep.mubr.msk.bf16.mxu1 %vm328_vm1, %v2296_v46 }
  0xa0   : > { %2212 = vmatmul.mubr.msk.bf16.gmra.mxu0 %vm328_vm1, %v2299_v49  ;;  %2194 = vmatmul.mubr.msk.bf16.gmra.mxu1 %vm328_vm1, %v2297_v47 }
  0xd8   : > { %v2057_v50 = vpop.f32.mrf.mxu0  ;;  %v2065_v51 = vpop.f32.mrf.mxu1 }
  0xda   : > { %v391_v52 = vpop.f32.mrf.mxu0  ;;  %v423_v53 = vpop.f32.mrf.mxu1 }
  0xdc   : > { %v2058_v54 = vpop.f32.mrf.mxu0  ;;  %v2066_v55 = vpop.f32.mrf.mxu1 }
  0xde   : > { %v394_v56 = vpop.f32.mrf.mxu0  ;;  %v426_v57 = vpop.f32.mrf.mxu1 }
  0xe0   : > { %v2061_v58 = vpop.f32.mrf.mxu0  ;;  %v2069_v59 = vpop.f32.mrf.mxu1 }
  0xe2   : > { %v407_v60 = vpop.f32.mrf.mxu0  ;;  %v439_v61 = vpop.f32.mrf.mxu1 }
  0xe4   : > { %v2062_v62 = vpop.f32.mrf.mxu0  ;;  %v2070_v63 = vpop.f32.mrf.mxu1 }
  0xe6   : > { %v410_v0 = vpop.f32.mrf.mxu0  ;;  %v2580_v1 = vpop.f32.mrf.mxu1 }
  0xe8   : > { %v2093_v2 = vpop.f32.mrf.mxu0  ;;  %v2075_v3 = vpop.f32.mrf.mxu1 }
  0xe9   : > { %v512_v4 = vadd.f32 %v2075_v3, %v2057_v50 }
  0xea   : > { %v647_v5 = vpop.f32.mrf.mxu0  ;;  %v503_v6 = vpop.f32.mrf.mxu1 }
  0xeb   : > { %v712_v7 = vadd.f32 %v2093_v2, %v512_v4  ;;  %v504_v8 = vadd.f32 %v503_v6, %v391_v52 }
  0xec   : > { %v2094_v9 = vpop.f32.mrf.mxu0  ;;  %v2076_v10 = vpop.f32.mrf.mxu1 }
  0xed   : > { %v710_v11 = vadd.f32 %v647_v5, %v504_v8  ;;  %v515_v12 = vadd.f32 %v2076_v10, %v2058_v54 }
  0xee   : > { %v650_v13 = vpop.f32.mrf.mxu0  ;;  %v506_v14 = vpop.f32.mrf.mxu1 }
  0xef   : > { %v713_v15 = vadd.f32 %v2094_v9, %v515_v12  ;;  %v507_v16 = vadd.f32 %v506_v14, %v394_v56 }
  0xf0   : > { %v2097_v17 = vpop.f32.mrf.mxu0  ;;  %v2079_v18 = vpop.f32.mrf.mxu1 }
  0xf1   : > { %v711_v19 = vadd.f32 %v650_v13, %v507_v16  ;;  %v528_v20 = vadd.f32 %v2079_v18, %v2061_v58 }
  0xf2   : > { %v663_v21 = vpop.f32.mrf.mxu0  ;;  %v519_v22 = vpop.f32.mrf.mxu1 }
  0xf3   : > { %v716_v23 = vadd.f32 %v2097_v17, %v528_v20  ;;  %v520_v24 = vadd.f32 %v519_v22, %v407_v60 }
  0xf4   : > { %v2098_v25 = vpop.f32.mrf.mxu0  ;;  %v2080_v26 = vpop.f32.mrf.mxu1 }
  0xf5   : > { %v714_v27 = vadd.f32 %v663_v21, %v520_v24  ;;  %v531_v28 = vadd.f32 %v2080_v26, %v2062_v62 }
  0xf6   : > { %v666_v29 = vpop.f32.mrf.mxu0  ;;  %v522_v30 = vpop.f32.mrf.mxu1 }
  0xf7   : > { %v717_v31 = vadd.f32 %v2098_v25, %v531_v28  ;;  %v523_v32 = vadd.f32 %v522_v30, %v410_v0 }
  0xf8   : > { %v2101_v33 = vpop.f32.mrf.mxu0  ;;  %v2083_v34 = vpop.f32.mrf.mxu1 }
  0xf9   : > { %v715_v35 = vadd.f32 %v666_v29, %v523_v32  ;;  %v544_v36 = vadd.f32 %v2083_v34, %v2065_v51 }
  0xfa   : > { %v679_v37 = vpop.f32.mrf.mxu0  ;;  %v535_v38 = vpop.f32.mrf.mxu1 }
  0xfb   : > { %v720_v39 = vadd.f32 %v2101_v33, %v544_v36  ;;  %v536_v40 = vadd.f32 %v535_v38, %v423_v53 }
  0xfc   : > { %v2102_v41 = vpop.f32.mrf.mxu0  ;;  %v2084_v42 = vpop.f32.mrf.mxu1 }
  0xfd   : > { %v718_v43 = vadd.f32 %v679_v37, %v536_v40  ;;  %v547_v44 = vadd.f32 %v2084_v42, %v2066_v55 }
  0xfe   : > { %v682_v45 = vpop.f32.mrf.mxu0  ;;  %v538_v46 = vpop.f32.mrf.mxu1 }
  0xff   : > { %v721_v47 = vadd.f32 %v2102_v41, %v547_v44  ;;  %v539_v48 = vadd.f32 %v538_v46, %v426_v57 }
 0x100   : > { %v2105_v49 = vpop.f32.mrf.mxu0  ;;  %v2087_v50 = vpop.f32.mrf.mxu1 }
 0x101   : > { %v719_v52 = vadd.f32 %v682_v45, %v539_v48  ;;  %v560_v54 = vadd.f32 %v2087_v50, %v2069_v59 }
 0x102   : > { %v695_v56 = vpop.f32.mrf.mxu0  ;;  %v551_v58 = vpop.f32.mrf.mxu1 }
 0x103   : > { %v2582_v60 = vadd.f32 %v2105_v49, %v560_v54  ;;  %v552_v51 = vadd.f32 %v551_v58, %v439_v61 }
 0x104   : > { %v2106_v62 = vpop.f32.mrf.mxu0  ;;  %v2088_v0 = vpop.f32.mrf.mxu1 }
 0x105   : > { %v2584_v53 = vadd.f32 %v695_v56, %v552_v51  ;;  %v563_v2 = vadd.f32 %v2088_v0, %v2070_v63 }
 0x106   : > { %v698_v3 = vpop.f32.mrf.mxu0  ;;  %v554_v55 = vpop.f32.mrf.mxu1 }
 0x107   : > { %v2586_v4 = vadd.f32 %v2106_v62, %v563_v2  ;;  %v555_v57 = vadd.f32 %v554_v55, %v2580_v1 }
 0x108   : > { %v2129_v5 = vpop.f32.mrf.mxu0  ;;  %v2111_v6 = vpop.f32.mrf.mxu1 }
 0x109   : > { %v2589_v8 = vadd.f32 %v698_v3, %v555_v57  ;;  %v870_v59 = vadd.f32 %v2111_v6, %v712_v7 }
 0x10a   : > { %v943_v9 = vpop.f32.mrf.mxu0  ;;  %v805_v10 = vpop.f32.mrf.mxu1 }
 0x10b   : > { %v2591_v12 = vadd.f32 %v2129_v5, %v870_v59  ;;  %v868_v61 = vadd.f32 %v805_v10, %v710_v11 }
 0x10c   : > { %v2130_v13 = vpop.f32.mrf.mxu0  ;;  %v2112_v14 = vpop.f32.mrf.mxu1 }
 0x10d   : > { %v2593_v16 = vadd.f32 %v943_v9, %v868_v61  ;;  %v871_v63 = vadd.f32 %v2112_v14, %v713_v15 }
 0x10e   : > { %v946_v17 = vpop.f32.mrf.mxu0  ;;  %v808_v18 = vpop.f32.mrf.mxu1 }
 0x10f   : > { %v2595_v20 = vadd.f32 %v2130_v13, %v871_v63  ;;  %v869_v1 = vadd.f32 %v808_v18, %v711_v19 }
 0x110   : > { %v2133_v21 = vpop.f32.mrf.mxu0  ;;  %v2115_v22 = vpop.f32.mrf.mxu1 }
 0x111   : > { %v2597_v24 = vadd.f32 %v946_v17, %v869_v1  ;;  %v874_v7 = vadd.f32 %v2115_v22, %v716_v23 }
 0x112   : > { %v959_v25 = vpop.f32.mrf.mxu0  ;;  %v821_v26 = vpop.f32.mrf.mxu1 }
 0x113   : > { %v2599_v28 = vadd.f32 %v2133_v21, %v874_v7  ;;  %v872_v11 = vadd.f32 %v821_v26, %v714_v27 }
 0x114   : > { %v2134_v29 = vpop.f32.mrf.mxu0  ;;  %v2116_v30 = vpop.f32.mrf.mxu1 }
 0x115   : > { %v2601_v32 = vadd.f32 %v959_v25, %v872_v11  ;;  %v875_v15 = vadd.f32 %v2116_v30, %v717_v31 }
 0x116   : > { %v962_v33 = vpop.f32.mrf.mxu0  ;;  %v824_v34 = vpop.f32.mrf.mxu1 }
 0x117   : > { %v2603_v36 = vadd.f32 %v2134_v29, %v875_v15  ;;  %v873_v19 = vadd.f32 %v824_v34, %v715_v35 }
 0x118   : > { %v2137_v37 = vpop.f32.mrf.mxu0  ;;  %v2119_v38 = vpop.f32.mrf.mxu1 }
 0x119   : > { %v2605_v40 = vadd.f32 %v962_v33, %v873_v19  ;;  %v878_v23 = vadd.f32 %v2119_v38, %v720_v39 }
 0x11a   : > { %v975_v41 = vpop.f32.mrf.mxu0  ;;  %v837_v42 = vpop.f32.mrf.mxu1 }
 0x11b   : > { %v2607_v44 = vadd.f32 %v2137_v37, %v878_v23  ;;  %v876_v27 = vadd.f32 %v837_v42, %v718_v43 }
 0x11c   : > { %v2138_v45 = vpop.f32.mrf.mxu0  ;;  %v2120_v46 = vpop.f32.mrf.mxu1 }
 0x11d   : > { %v2609_v48 = vadd.f32 %v975_v41, %v876_v27  ;;  %v879_v31 = vadd.f32 %v2120_v46, %v721_v47 }
 0x11e   : > { %v978_v49 = vpop.f32.mrf.mxu0  ;;  %v840_v50 = vpop.f32.mrf.mxu1 }
 0x11f   : > { %v2611_v54 = vadd.f32 %v2138_v45, %v879_v31  ;;  %v877_v35 = vadd.f32 %v840_v50, %v719_v52 }
 0x120   : > { %v2141_v56 = vpop.f32.mrf.mxu0  ;;  %v2123_v58 = vpop.f32.mrf.mxu1 }
 0x121   : > { %v2613_v51 = vadd.f32 %v978_v49, %v877_v35  ;;  %v882_v41 = vadd.f32 %v2123_v58, %v2582_v60 }
 0x122   : > { %v991_v39 = vpop.f32.mrf.mxu0  ;;  %v853_v62 = vpop.f32.mrf.mxu1 }
 0x123   : > { %v880_v45 = vadd.f32 %v853_v62, %v2584_v53  ;;  %v2662_v53 = vld [vmem:[%s2814_s2] ss:$0 sm:$0xff] }
 0x124   : > { %v2615_v0 = vpop.f32.mrf.mxu0  ;;  %v2124_v2 = vpop.f32.mrf.mxu1 }
 0x125   : > { %v1018_v60 = vadd.f32 %v991_v39, %v880_v45 }
 0x126   : > { %v2617_v43 = vpop.f32.mrf.mxu0  ;;  %v856_v3 = vpop.f32.mrf.mxu1 }
 0x127   : > { %v881_v58 = vadd.f32 %v856_v3, %v2589_v8 }
 0x128   : > { %v2165_v55 = vpop.f32.mrf.mxu0  ;;  %v2147_v57 = vpop.f32.mrf.mxu1 }
 0x129   : > { %v1146_v37 = vadd.f32 %v2147_v57, %v2591_v12  ;;  %v1020_v57 = vadd.f32 %v2141_v56, %v882_v41 }
 0x12a   : > { %v1239_v47 = vpop.f32.mrf.mxu0  ;;  %v1081_v5 = vpop.f32.mrf.mxu1 }
 0x12b   : > { %v1144_v42 = vadd.f32 %v1081_v5, %v2593_v16  ;;  %v1304_v49 = vadd.f32 %v2165_v55, %v1146_v37  ;;  %v883_v16 = vadd.f32 %v2124_v2, %v2586_v4  ;;  %v2672_v2 = vld [vmem:[%s2815_s3] ss:$0 sm:$0xff] }
 0x12c   : > { %v2166_v6 = vpop.f32.mrf.mxu0  ;;  %v2148_v59 = vpop.f32.mrf.mxu1 }
 0x12d   : > { %v1147_v46 = vadd.f32 %v2148_v59, %v2595_v20 }
 0x12e   : > { %v1242_v9 = vpop.f32.mrf.mxu0  ;;  %v1084_v52 = vpop.f32.mrf.mxu1 }
 0x12f   : > { %v1145_v50 = vadd.f32 %v1084_v52, %v2597_v24  ;;  %v1305_v5 = vadd.f32 %v2166_v6, %v1147_v46 }
 0x130   : > { %v2619_v10 = vpop.f32.mrf.mxu0  ;;  %v2151_v61 = vpop.f32.mrf.mxu1 }
 0x131   : > { %v1303_v62 = vadd.f32 %v1242_v9, %v1145_v50  ;;  %v1150_v24 = vadd.f32 %v2151_v61, %v2599_v28 }
 0x132   : > { %v2621_v13 = vpop.f32.mrf.mxu0  ;;  %v1097_v14 = vpop.f32.mrf.mxu1 }
 0x133   : > { %v1148_v59 = vadd.f32 %v1097_v14, %v2601_v32  ;;  %v2677_v32 = vadd.f32 %v2615_v0, %v883_v16 }
 0x134   : > { %v2623_v63 = vpop.f32.mrf.mxu0  ;;  %v2152_v17 = vpop.f32.mrf.mxu1 }
 0x135   : > { %v1151_v39 = vadd.f32 %v2152_v17, %v2603_v36  ;;  %v2680_v36 = vadd.f32 %v2617_v43, %v881_v58  ;;  %v1306_v0 = vadd.f32 %v2621_v13, %v1148_v59 }
 0x136   : > { %v2625_v18 = vpop.f32.mrf.mxu0  ;;  %v1100_v1 = vpop.f32.mrf.mxu1 }
 0x137   : > { %v1149_v4 = vadd.f32 %v1100_v1, %v2605_v40  ;;  %v1309_v37 = vadd.f32 %v2623_v63, %v1151_v39 }
 0x138   : > { %v2627_v21 = vpop.f32.mrf.mxu0  ;;  %v2155_v22 = vpop.f32.mrf.mxu1 }
 0x139   : > { %v1154_v8 = vadd.f32 %v2155_v22, %v2607_v44  ;;  %v1307_v43 = vadd.f32 %v2625_v18, %v1149_v4 }
 0x13a   : > { %v2629_v7 = vpop.f32.mrf.mxu0  ;;  %v1113_v25 = vpop.f32.mrf.mxu1 }
 0x13b   : > { %v1152_v6 = vadd.f32 %v1113_v25, %v2609_v48 }
 0x13c   : > { %v2631_v26 = vpop.f32.mrf.mxu0  ;;  %v2156_v11 = vpop.f32.mrf.mxu1 }
 0x13d   : > { %v1155_v40 = vadd.f32 %v2156_v11, %v2611_v54  ;;  %v1312_v54 = vadd.f32 %v2627_v21, %v1154_v8 }
 0x13e   : > { %v2633_v29 = vpop.f32.mrf.mxu0  ;;  %v1116_v30 = vpop.f32.mrf.mxu1 }
 0x13f   : > { %v1153_v44 = vadd.f32 %v1116_v30, %v2613_v51  ;;  %v1310_v51 = vadd.f32 %v2629_v7, %v1152_v6  ;;  %v2695_v41 = vadd.f32 %v2631_v26, %v1155_v40 }
 0x140   : > { %v2635_v15 = vpop.f32.mrf.mxu0  ;;  %v2637_v33 = vpop.f32.mrf.mxu1 }
 0x141   : > { %v1158_v18 = vadd.f32 %v2637_v33, %v1020_v57 }
 0x142   : > { %v2639_v34 = vpop.f32.mrf.mxu0  ;;  %v2641_v19 = vpop.f32.mrf.mxu1 }
 0x143   : > { %2817 = vst [vmem:[#allocation2_spill] sm:$0xff] %v2639_v34  ;;  %v1156_v21 = vadd.f32 %v2641_v19, %v1018_v60 }
 0x144   : > { %v2644_v38 = vpop.f32.mrf.mxu0  ;;  %v2646_v23 = vpop.f32.mrf.mxu1 }
 0x145   : > { %2818 = vst [vmem:[#allocation3_spill] sm:$0xff] %v2644_v38  ;;  %2819 = vst [vmem:[#allocation4_spill] sm:$0xff] %v2646_v23  ;;  %v1302_v38 = vadd.f32 %v1239_v47, %v1144_v42 }
 0x146   : > { %v2650_v27 = vpop.f32.mrf.mxu0  ;;  %v2654_v31 = vpop.f32.mrf.mxu1 }
 0x148   : > { %v2201_v12 = vpop.f32.mrf.mxu0  ;;  %v2183_v35 = vpop.f32.mrf.mxu1 }
 0x149   : > { %v1442_v23 = vadd.f32 %v2183_v35, %v1304_v49 }
 0x14a   : > { %v1515_v34 = vpop.f32.mrf.mxu0  ;;  %v1377_v20 = vpop.f32.mrf.mxu1 }
 0x14b   : > { %v1580_v55 = vadd.f32 %v2201_v12, %v1442_v23  ;;  %v1440_v56 = vadd.f32 %v1377_v20, %v1302_v38  ;;  %v2820_v20 = vld [vmem:[#allocation2_spill] sm:$0xff] }
 0x14c   : > { %v2202_v47 = vpop.f32.mrf.mxu0  ;;  %v2184_v3 = vpop.f32.mrf.mxu1 }
 0x14d   : > { %v1603_v28 = vmul.f32 %v2662_v53, %v1580_v55  ;;  %v1578_v9 = vadd.f32 %v1515_v34, %v1440_v56  ;;  %v1443_v52 = vadd.f32 %v2184_v3, %v1305_v5  ;;  %v1308_v34 = vadd.f32 %v2619_v10, %v1150_v24 }
 0x14e   : > { %v1518_v61 = vpop.f32.mrf.mxu0  ;;  %v1380_v14 = vpop.f32.mrf.mxu1  ;;  %v2698_v10 = vadd.f32 %v2633_v29, %v1153_v44  ;;  %v1316_v5 = vadd.f32 %v2635_v15, %v1158_v18 }
 0x14f   : > { %v1626_v17 = vadd.f32 %v2672_v2, %v1603_v28  ;;  %v1601_v48 = vmul.f32 %v2662_v53, %v1578_v9  ;;  %v1581_v1 = vadd.f32 %v2202_v47, %v1443_v52  ;;  %v1441_v22 = vadd.f32 %v1380_v14, %v1303_v62 }
 0x150   : > { %v2205_v25 = vpop.f32.mrf.mxu0  ;;  %v2187_v38 = vpop.f32.mrf.mxu1  ;;  %v2708_v62 = vadd.f32 %v2820_v20, %v1156_v21 }
 0x151   : > { %v1624_v11 = vadd.f32 %v2672_v2, %v1601_v48  ;;  %v1604_v30 = vmul.f32 %v2662_v53, %v1581_v1  ;;  %v1579_v13 = vadd.f32 %v1518_v61, %v1441_v22  ;;  %v1446_v63 = vadd.f32 %v2187_v38, %v1308_v34 }
 0x152   : > { %v1531_v23 = vpop.f32.mrf.mxu0  ;;  %v1393_v42 = vpop.f32.mrf.mxu1  ;;  %v1658_v45 = vmul.f32 0.01, %v1626_v17  ;;  %vm1642_vm2 = vcmp.gt.f32.partialorder %v1626_v17, 0.0 }
 0x153   : > { %v1627_v7 = vadd.f32 %v2672_v2, %v1604_v30  ;;  %v1656_v49 = vmul.f32 0.01, %v1624_v11  ;;  %v1602_v50 = vmul.f32 %v2662_v53, %v1579_v13  ;;  %v1584_v12 = vadd.f32 %v2205_v25, %v1446_v63 }
 0x154   : > { %v2206_v46 = vpop.f32.mrf.mxu0  ;;  %v1444_v26 = vadd.f32 %v1393_v42, %v1306_v0  ;;  %v2188_v35 = vpop.f32.mrf.mxu1  ;;  %vm1640_vm3 = vcmp.gt.f32.partialorder %v1624_v11, 0.0  ;;  %v2710_v47 = vsel %vm1642_vm2, %v1626_v17, %v1658_v45  ;;  %v2821_v45 = vld [vmem:[#allocation4_spill] sm:$0xff] }
 0x155   : > { %v1659_v29 = vmul.f32 0.01, %v1627_v7  ;;  %v1447_v16 = vadd.f32 %v2188_v35, %v1309_v37  ;;  %vm1643_vm4 = vcmp.gt.f32.partialorder %v1627_v7, 0.0  ;;  %v1625_v33 = vadd.f32 %v2672_v2, %v1602_v50 }
 0x156   : > { %v1534_v58 = vpop.f32.mrf.mxu0  ;;  %v1607_v19 = vmul.f32 %v2662_v53, %v1584_v12  ;;  %v1582_v57 = vadd.f32 %v1531_v23, %v1444_v26  ;;  %v1396_v60 = vpop.f32.mrf.mxu1  ;;  %v2712_v59 = vsel %vm1640_vm3, %v1624_v11, %v1656_v49 }
 0x157   : > { %v1585_v24 = vadd.f32 %v2206_v46, %v1447_v16  ;;  %v1445_v55 = vadd.f32 %v1396_v60, %v1307_v43  ;;  %v2716_v3 = vsel %vm1643_vm4, %v1627_v7, %v1659_v29  ;;  %vm1641_vm5 = vcmp.gt.f32.partialorder %v1625_v33, 0.0 }
 0x158   : > { %v2209_v56 = vpop.f32.mrf.mxu0  ;;  %v1630_v39 = vadd.f32 %v2672_v2, %v1607_v19  ;;  %v1605_v4 = vmul.f32 %v2662_v53, %v1582_v57  ;;  %v2191_v8 = vpop.f32.mrf.mxu1  ;;  %v1657_v22 = vmul.f32 0.01, %v1625_v33  ;;  %v1159_v7 = vadd.f32 %v2821_v45, %v2677_v32 }
 0x159   : > { %v1608_v6 = vmul.f32 %v2662_v53, %v1585_v24  ;;  %v1583_v15 = vadd.f32 %v1534_v58, %v1445_v55  ;;  %v1450_v28 = vadd.f32 %v2191_v8, %v1312_v54  ;;  %v1157_v16 = vadd.f32 %v2654_v31, %v2680_v36 }
 0x15a   : > { %v1547_v9 = vpop.f32.mrf.mxu0  ;;  %vm1646_vm6 = vcmp.gt.f32.partialorder %v1630_v39, 0.0  ;;  %v1662_v52 = vmul.f32 0.01, %v1630_v39  ;;  %v1628_v61 = vadd.f32 %v2672_v2, %v1605_v4  ;;  %v1409_v40 = vpop.f32.mrf.mxu1  ;;  %v2740_v46 = vsel %vm1641_vm5, %v1625_v33, %v1657_v22 }
 0x15b   : > { %v1631_v44 = vadd.f32 %v2672_v2, %v1608_v6  ;;  %v1606_v14 = vmul.f32 %v2662_v53, %v1583_v15  ;;  %v1588_v17 = vadd.f32 %v2209_v56, %v1450_v28  ;;  %v1448_v48 = vadd.f32 %v1409_v40, %v1310_v51 }
 0x15c   : > { %v2210_v1 = vpop.f32.mrf.mxu0  ;;  %v2722_v25 = vsel %vm1646_vm6, %v1630_v39, %v1662_v52  ;;  %vm1644_vm7 = vcmp.gt.f32.partialorder %v1628_v61, 0.0  ;;  %v1660_v34 = vmul.f32 0.01, %v1628_v61  ;;  %v2192_v0 = vpop.f32.mrf.mxu1  ;;  %v1315_v4 = vadd.f32 %v2650_v27, %v1157_v16 }
 0x15d   : > { %v1690_v37 = vmax.f32 %v2710_v47, %v2722_v25  ;;  %vm1647_vm8 = vcmp.gt.f32.partialorder %v1631_v44, 0.0  ;;  %v1663_v43 = vmul.f32 0.01, %v1631_v44  ;;  %v1629_v38 = vadd.f32 %v2672_v2, %v1606_v14 }
 0x15e   : > { %v1550_v54 = vpop.f32.mrf.mxu0  ;;  %v2729_v11 = vsel %vm1644_vm7, %v1628_v61, %v1660_v34  ;;  %v1611_v51 = vmul.f32 %v2662_v53, %v1588_v17  ;;  %v1586_v30 = vadd.f32 %v1547_v9, %v1448_v48  ;;  %v1451_v23 = vadd.f32 %v2192_v0, %v2695_v41  ;;  %v1412_v13 = vpop.f32.mrf.mxu1 }
 0x15f   : > { %v1688_v63 = vmax.f32 %v2712_v59, %v2729_v11  ;;  %v2735_v42 = vsel %vm1647_vm8, %v1631_v44, %v1663_v43  ;;  %vm1645_vm9 = vcmp.gt.f32.partialorder %v1629_v38, 0.0  ;;  %v1661_v18 = vmul.f32 0.01, %v1629_v38 }
 0x160   : > { %v2213_v21 = vpop.f32.mrf.mxu0  ;;  %v1691_v41 = vmax.f32 %v2716_v3, %v2735_v42  ;;  %v1589_v49 = vadd.f32 %v2210_v1, %v1451_v23  ;;  %v2195_v50 = vpop.f32.mrf.mxu1  ;;  %v1609_v26 = vmul.f32 %v2662_v53, %v1586_v30  ;;  %v1449_v32 = vadd.f32 %v1412_v13, %v2698_v10  ;;  %v2823_v10 = vld [vmem:[#allocation3_spill] sm:$0xff] }
 0x161   : > { %v2750_v12 = vsel %vm1645_vm9, %v1629_v38, %v1661_v18  ;;  %v1454_v35 = vadd.f32 %v2195_v50, %v1316_v5  ;;  %v1634_v33 = vadd.f32 %v2672_v2, %v1611_v51  ;;  %v1317_v5 = vadd.f32 %v2823_v10, %v1159_v7 }
 0x162   : > { %v1563_v29 = vpop.f32.mrf.mxu0  ;;  %v1689_v58 = vmax.f32 %v2740_v46, %v2750_v12  ;;  %v1425_v19 = vpop.f32.mrf.mxu1  ;;  %v1612_v57 = vmul.f32 %v2662_v53, %v1589_v49  ;;  %v1587_v60 = vadd.f32 %v1550_v54, %v1449_v32  ;;  %v1632_v31 = vadd.f32 %v2672_v2, %v1609_v26 }
 0x163   : > { %v1592_v20 = vadd.f32 %v2213_v21, %v1454_v35  ;;  %v1452_v24 = vadd.f32 %v1425_v19, %v2708_v62  ;;  %v1666_v15 = vmul.f32 0.01, %v1634_v33  ;;  %vm1650_vm10 = vcmp.gt.f32.partialorder %v1634_v33, 0.0 }
 0x164   : > { %v2196_v55 = vpop.f32.mrf.mxu1  ;;  %v2214_v39 = vpop.f32.mrf.mxu0  ;;  %v1635_v62 = vadd.f32 %v2672_v2, %v1612_v57  ;;  %v1610_v28 = vmul.f32 %v2662_v53, %v1587_v60  ;;  %v1664_v44 = vmul.f32 0.01, %v1632_v31  ;;  %vm1648_vm12 = vcmp.gt.f32.partialorder %v1632_v31, 0.0 }
 0x165   : > { %v1615_v36 = vmul.f32 %v2662_v53, %v1592_v20  ;;  %v1590_v56 = vadd.f32 %v1563_v29, %v1452_v24  ;;  %v1455_v8 = vadd.f32 %v2196_v55, %v1317_v5  ;;  %v1682_v22 = vsel %vm1650_vm10, %v1634_v33, %v1666_v15 }
 0x166   : > { %v1428_v6 = vpop.f32.mrf.mxu1  ;;  %v1566_v14 = vpop.f32.mrf.mxu0  ;;  %v1667_v34 = vmul.f32 0.01, %v1635_v62  ;;  %v1633_v0 = vadd.f32 %v2672_v2, %v1610_v28  ;;  %vm1651_vm14 = vcmp.gt.f32.partialorder %v1635_v62, 0.0  ;;  %v1680_v23 = vsel %vm1648_vm12, %v1632_v31, %v1664_v44 }
 0x167   : > { %v1638_v9 = vadd.f32 %v2672_v2, %v1615_v36  ;;  %v1613_v52 = vmul.f32 %v2662_v53, %v1590_v56  ;;  %v1593_v61 = vadd.f32 %v2214_v39, %v1455_v8  ;;  %v1453_v40 = vadd.f32 %v1428_v6, %v1315_v4 }
 0x168   : > { %v1665_v21 = vmul.f32 0.01, %v1633_v0  ;;  %v1683_v50 = vsel %vm1651_vm14, %v1635_v62, %v1667_v34  ;;  %vm1649_vm0 = vcmp.gt.f32.partialorder %v1633_v0, 0.0 }
 0x169   : > { %vm1654_vm11 = vcmp.gt.f32.partialorder %v1638_v9, 0.0  ;;  %v1670_v17 = vmul.f32 0.01, %v1638_v9  ;;  %v1636_v27 = vadd.f32 %v2672_v2, %v1613_v52  ;;  %v1616_v48 = vmul.f32 %v2662_v53, %v1593_v61 }
 0x16a   : > { %v1591_v1 = vadd.f32 %v1566_v14, %v1453_v40  ;;  %v1681_v29 = vsel %vm1649_vm0, %v1633_v0, %v1665_v21 }
 0x16b   : > { %v1686_v43 = vsel %vm1654_vm11, %v1638_v9, %v1670_v17  ;;  %vm1652_vm13 = vcmp.gt.f32.partialorder %v1636_v27, 0.0  ;;  %v1668_v38 = vmul.f32 0.01, %v1636_v27  ;;  %v1639_v54 = vadd.f32 %v2672_v2, %v1616_v48 }
 0x16c   : > { %v1694_v51 = vmax.f32 %v1682_v22, %v1686_v43  ;;  %v1614_v30 = vmul.f32 %v2662_v53, %v1591_v1 }
 0x16d   : > { %v1684_v13 = vsel %vm1652_vm13, %v1636_v27, %v1668_v38  ;;  %vm1655_vm15 = vcmp.gt.f32.partialorder %v1639_v54, 0.0  ;;  %v1671_v18 = vmul.f32 0.01, %v1639_v54 }
 0x16e   : > { %v1698_v45 = vmax.f32 %v1690_v37, %v1694_v51  ;;  %v1692_v7 = vmax.f32 %v1680_v23, %v1684_v13  ;;  %v1637_v49 = vadd.f32 %v2672_v2, %v1614_v30 }
 0x16f   : > { %v1687_v26 = vsel %vm1655_vm15, %v1639_v54, %v1671_v18 }
 0x170   : > { %1702 = vst [vmem:[%s233_s10 + $0x10] sm:$0xff] %v1698_v45  ;;  %v1696_v53 = vmax.f32 %v1688_v63, %v1692_v7  ;;  %v1695_v32 = vmax.f32 %v1683_v50, %v1687_v26  ;;  %vm1653_vm1 = vcmp.gt.f32.partialorder %v1637_v49, 0.0  ;;  %v1669_v35 = vmul.f32 0.01, %v1637_v49 }
 0x172   : > { %1700 = vst [vmem:[%s233_s10] sm:$0xff] %v1696_v53  ;;  %v1699_v47 = vmax.f32 %v1691_v41, %v1695_v32  ;;  %v1685_v25 = vsel %vm1653_vm1, %v1637_v49, %v1669_v35 }
 0x173   : > { %v1693_v37 = vmax.f32 %v1681_v29, %v1685_v25 }
 0x174   : > { %1703 = vst [vmem:[%s233_s10 + $0x18] sm:$0xff] %v1699_v47 }
 0x175   : > { %v1697_v2 = vmax.f32 %v1689_v58, %v1693_v37 }
 0x177   : > { %1701 = vst [vmem:[%s233_s10 + $0x8] sm:$0xff] %v1697_v2 }
 0x178 PF: > { %s14_s19 = sadd.s32 1, %s2338_s19   ;;  %s2824_s15 = smov %s2330_s17 }
 0x179   : > { %p11_p8 = scmp.ge.s32.totalorder %s14_s19, 6   ;;  %s2825_s16 = smov %s2334_s18 }
 0x17a   : > { %s2826_s17 = smov %s2829_s20  ;;  %s2827_s18 = smov %s2833_s21 }
 0x17b   :  { %13 = sbr.rel (!%p11_p8) target bundleno = 3 (0x3), region = 81 }

// kernel: basic_conv_block.2
= control target key start
LH: loop header
LB: loop body
LE: loop exit
PB: predicated region body
PF: predicated region fallthrough
CT: control target
= control target key end

     0   :  { %s2225_s9 = smov 0   ;;  %s2227_s10 = smov 0   ;;  %s2635_s0 = inlined_call_operand.vmem [shape: bf16[4,8,40,4], index: 0, kind: input, shape index: {}]   ;;  %s2636_s1 = inlined_call_operand.vmem [shape: bf16[9,4,128], index: 1, kind: input, shape index: {}]   ;;  %s2637_s2 = inlined_call_operand.vmem [shape: f32[2,2,128], index: 2, kind: output, shape index: {}]  }
   0x1   :  { %s2229_s11 = smov 0   ;;  %s2231_s12 = smov 0  }
   0x2   :  { %s2233_s13 = smov 0  }
   0x3 LB: > { %s21_s14 = sadd.s32 1, %s2199_s11  ;;  %s24_s15 = sadd.s32 1, %s2203_s12  ;;  %s2207_s13 = sphi %s2233_s13, %s12_s13   ;;  %s2203_s12 = sphi %s2231_s12, %s2671_s12   ;;  %s2199_s11 = sphi %s2229_s11, %s2670_s11   ;;  %s2195_s10 = sphi %s2227_s10, %s2669_s10   ;;  %s2191_s9 = sphi %s2225_s9, %s2668_s9  }
   0x4   : > { %p22_p0 = scmp.ge.s32.totalorder %s21_s14, 2  ;;  %p1665_p1 = scmp.ge.s32.totalorder %s2207_s13, 1 }
   0x5   : > { %p132_p2 = scmp.lt.s32.totalorder %s2207_s13, 5 }
   0x6   : > { %s2673_s14 = smov (%p22_p0, %s21_s14), 0  ;;  %s2675_s15 = smov (!%p22_p0, %s24_s15), %s2203_s12 }
   0x7   : > { %p133_p3 = pnand %p1665_p1, %p132_p2  ;;  %p26_p4 = scmp.ge.s32.totalorder %s2675_s15, 2 }
   0x9   : > { %s2677_s15 = smov (%p26_p4, %s2675_s15), 0  ;;  %136 = sbr.rel (%p133_p3) target bundleno = 396 (0x18c), region = 28 }
   0xe   : > { %v1701_v0 = vld [vmem:[%s2636_s1 + $0x2] sm:$0x3]  ;;  %vm286_vm0 = vcmask 1041408   ;;  %p164_p5 = scmp.lt.s32.totalorder %s2195_s10, 1  ;;  %s1666_s18 = sshll.u32 %s2195_s10, 1  ;;  %vm261_vm1 = vcmask 31744  }
   0xf   : > { %2086 = vmatprep.subr.msk.bf16.mxu1 %vm286_vm0, %v1701_v0  ;;  %2085 = vmatprep.subr.msk.bf16.mxu0 %vm286_vm0, %v1701_v0  ;;  %v288_v1 = vsel %vm286_vm0, %v1701_v0, 0  ;;  %s156_s19 = sadd.s32 %s2191_s9, %s1666_s18  ;;  %v228_v2 = vld [vmem:[%s2636_s1] sm:$0x3]  ;;  %v1730_v3 = vld [vmem:[%s2636_s1 + $0x4] sm:$0x3]  ;;  %vm1585_vm2 = vcmask 1040384  }
  0x10   : > { %s2679_s10 = smov (!%p164_p5, %s2195_s10), 1  ;;  %2084 = vmatpush3.bf16.msra.mxu1 %v288_v1  ;;  %1922 = vmatpush3.bf16.msra.mxu0 %v288_v1  ;;  %p157_p6 = scmp.lt.s32.totalorder %s156_s19, 3  ;;  %v544_v7 = vsel %vm286_vm0, %v1730_v3, 0  ;;  %v1747_v8 = vld [vmem:[%s2636_s1 + $0x6] sm:$0x3]  ;;  %v400_v10 = vsel %vm286_vm0, %v228_v2, 0 }
  0x11   : > { %2087 = vmatprep.subr.msk.bf16.mxu1 %vm286_vm0, %v228_v2  ;;  %2088 = vmatprep.subr.msk.bf16.mxu0 %vm286_vm0, %v1730_v3  ;;  %s1668_s24 = sshll.u32 %s2679_s10, 1  ;;  %v1762_v11 = vld [vmem:[%s2636_s1 + $0x8] sm:$0x3]  ;;  %v702_v19 = vsel %vm286_vm0, %v1747_v8, 0  ;;  %v1777_v21 = vld [vmem:[%s2636_s1 + $0xa] sm:$0x3] }
  0x12   : > { %s2275_s27 = scalar_lea.vmem %s2637_s2, %s1668_s24  ;;  %s2681_s19 = smov (!%p157_p6, %s156_s19), 3  ;;  %v840_v18 = vsel %vm286_vm0, %v1762_v11, 0  ;;  %v1798_v22 = vld [vmem:[%s2636_s1 + $0xc] sm:$0x3]  ;;  %v978_v29 = vsel %vm286_vm0, %v1777_v21, 0 }
  0x13   : > { %s2095_s28 = smul.u32 160, %s2681_s19  ;;  %v1136_v28 = vsel %vm286_vm0, %v1798_v22, 0  ;;  %v1813_v30 = vld [vmem:[%s2636_s1 + $0xe] sm:$0x3]  ;;  %v1828_v31 = vld [vmem:[%s2636_s1 + $0x10] sm:$0x3] }
  0x14   : > { %v1412_v38 = vsel %vm286_vm0, %v1828_v31, 0  ;;  %v1274_v39 = vsel %vm286_vm0, %v1813_v30, 0  ;;  %p1837_p7 = scmp.ne.s32.totalorder %s2191_s9, 0 }
  0x15   : > { %s2280_s3 = scalar_lea.vmem %s2635_s0, %s2095_s28 }
  0x16   : > { %v2137_v4 = vld [vmem:[%s2280_s3 + $0x28] sm:$0xff]   ;;  %v2284_v5 = vld [vmem:[%s2280_s3 + $0x78] sm:$0xff]   ;;  %v2139_v6 = vld [vmem:[%s2280_s3 + $0x30] sm:$0xff]  }
  0x17   : > { %1923 = vmatprep.mubr.msk.bf16.mxu0 %vm261_vm1, %v2137_v4  ;;  %1931 = vmatprep.mubr.msk.bf16.mxu1 %vm261_vm1, %v2284_v5  ;;  %v2295_v9 = vld [vmem:[%s2280_s3 + $0x80] sm:$0xff]   ;;  %v2141_v12 = vld [vmem:[%s2280_s3 + $0x14] sm:$0xff]   ;;  %v2315_v15 = vld [vmem:[%s2280_s3 + $0x6c] sm:$0xff]  }
  0x18   : > { %1924 = vmatmul.mubr.msk.bf16.vlgmr.msra.gmra.mxu0 %vm261_vm1, %v2139_v6  ;;  %1932 = vmatmul.mubr.msk.bf16.vlgmr.msra.gmra.mxu1 %vm261_vm1, %v2295_v9  ;;  %v2306_v13 = vld [vmem:[%s2280_s3 + $0x64] sm:$0xff]   ;;  %v2143_v14 = vld [vmem:[%s2280_s3 + $0x1c] sm:$0xff]   ;;  %v2149_v24 = vld [vmem:[%s2280_s3 + $0x50] sm:$0xff]  }
  0x19   : > { %1958 = vmatpush3.bf16.msra.mxu0 %v544_v7  ;;  %1940 = vmatpush3.bf16.msra.mxu1 %v400_v10  ;;  %v2145_v16 = vld [vmem:[%s2280_s3] sm:$0xff]   ;;  %v2146_v17 = vld [vmem:[%s2280_s3 + $0x8] sm:$0xff]   ;;  %v2150_v25 = vld [vmem:[%s2280_s3 + $0x58] sm:$0xff]  }
  0x1a   : > { %1927 = vmatprep.mubr.msk.bf16.mxu0 %vm261_vm1, %v2141_v12  ;;  %1935 = vmatprep.mubr.msk.bf16.mxu1 %vm261_vm1, %v2306_v13  ;;  %v2147_v20 = vld [vmem:[%s2280_s3 + $0x3c] sm:$0xff]   ;;  %v2148_v23 = vld [vmem:[%s2280_s3 + $0x44] sm:$0xff]   ;;  %v2151_v26 = vld [vmem:[%s2280_s3 + $0x8c] sm:$0xff]  }
  0x1b   : > { %2089 = vmatprep.subr.msk.bf16.mxu1 %vm286_vm0, %v1747_v8  ;;  %2090 = vmatprep.subr.msk.bf16.mxu0 %vm286_vm0, %v1762_v11  ;;  %v2152_v27 = vld [vmem:[%s2280_s3 + $0x94] sm:$0xff]   ;;  %v2154_v32 = vld [vmem:[%s2280_s3 + $0x2c] sm:$0xff]   ;;  %v2153_v33 = vld [vmem:[%s2280_s3 + $0x4] sm:$0xff]  }
  0x1c   : > { %v2156_v34 = vld [vmem:[%s2280_s3 + $0x34] sm:$0xff]   ;;  %v2155_v35 = vld [vmem:[%s2280_s3 + $0xc] sm:$0xff]   ;;  %v2158_v37 = vld [vmem:[%s2280_s3 + $0x20] sm:$0xff]  }
  0x1d   : > { %v2157_v36 = vld [vmem:[%s2280_s3 + $0x18] sm:$0xff]   ;;  %v2161_v43 = vld [vmem:[%s2280_s3 + $0x40] sm:$0xff]   ;;  %v2163_v45 = vld [vmem:[%s2280_s3 + $0x48] sm:$0xff]  }
  0x1e   : > { %v2159_v40 = vld [vmem:[%s2280_s3 + $0x54] sm:$0xff]   ;;  %v2160_v41 = vld [vmem:[%s2280_s3 + $0x5c] sm:$0xff]   ;;  %v2164_v44 = vld [vmem:[%s2280_s3 + $0x84] sm:$0xff]  }
  0x1f   : > { %v2162_v42 = vld [vmem:[%s2280_s3 + $0x7c] sm:$0xff]   ;;  %v2165_v46 = vld [vmem:[%s2280_s3 + $0x68] sm:$0xff]   ;;  %v2166_v47 = vld [vmem:[%s2280_s3 + $0x70] sm:$0xff]  }
  0x20   : > { %1928 = vmatmul.mubr.msk.bf16.gmra.mxu0 %vm261_vm1, %v2143_v14  ;;  %1936 = vmatmul.mubr.msk.bf16.gmra.mxu1 %vm261_vm1, %v2315_v15  ;;  %v2167_v48 = vld [vmem:[%s2280_s3 + $0x90] sm:$0xff]   ;;  %v2168_v49 = vld [vmem:[%s2280_s3 + $0x98] sm:$0xff]  }
  0x21   : > { %1959 = vmatprep.mubr.msk.bf16.mxu0 %vm261_vm1, %v2141_v12  ;;  %1941 = vmatprep.mubr.msk.bf16.mxu1 %vm261_vm1, %v2145_v16 }
  0x28   : > { %1960 = vmatmul.mubr.msk.bf16.vlgmr.msra.gmra.mxu0 %vm261_vm1, %v2143_v14  ;;  %1942 = vmatmul.mubr.msk.bf16.vlgmr.msra.gmra.mxu1 %vm261_vm1, %v2146_v17 }
  0x29   : > { %1994 = vmatpush3.bf16.msra.mxu0 %v840_v18  ;;  %1976 = vmatpush3.bf16.msra.mxu1 %v702_v19 }
  0x2a   : > { %1945 = vmatprep.mubr.msk.bf16.mxu1 %vm261_vm1, %v2137_v4  ;;  %1963 = vmatprep.mubr.msk.bf16.mxu0 %vm261_vm1, %v2147_v20 }
  0x2b   : > { %2091 = vmatprep.subr.msk.bf16.mxu1 %vm286_vm0, %v1777_v21  ;;  %2092 = vmatprep.subr.msk.bf16.mxu0 %vm286_vm0, %v1798_v22 }
  0x30   : > { %1964 = vmatmul.mubr.msk.bf16.gmra.mxu0 %vm261_vm1, %v2148_v23  ;;  %1946 = vmatmul.mubr.msk.bf16.gmra.mxu1 %vm261_vm1, %v2139_v6 }
  0x31   : > { %1967 = vmatprep.mubr.msk.bf16.mxu0 %vm261_vm1, %v2306_v13  ;;  %1949 = vmatprep.mubr.msk.bf16.mxu1 %vm261_vm1, %v2149_v24 }
  0x38   : > { %1968 = vmatmul.mubr.msk.bf16.gmra.mxu0 %vm261_vm1, %v2315_v15  ;;  %1950 = vmatmul.mubr.msk.bf16.gmra.mxu1 %vm261_vm1, %v2150_v25 }
  0x39   : > { %1971 = vmatprep.mubr.msk.bf16.mxu0 %vm261_vm1, %v2151_v26  ;;  %1953 = vmatprep.mubr.msk.bf16.mxu1 %vm261_vm1, %v2284_v5 }
  0x40   : > { %1972 = vmatmul.mubr.msk.bf16.gmra.mxu0 %vm261_vm1, %v2152_v27  ;;  %1954 = vmatmul.mubr.msk.bf16.gmra.mxu1 %vm261_vm1, %v2295_v9 }
  0x41   : > { %1995 = vmatprep.mubr.msk.bf16.mxu0 %vm261_vm1, %v2284_v5  ;;  %1977 = vmatprep.mubr.msk.bf16.mxu1 %vm261_vm1, %v2149_v24 }
  0x48   : > { %1996 = vmatmul.mubr.msk.bf16.vlgmr.msra.gmra.mxu0 %vm261_vm1, %v2295_v9  ;;  %1978 = vmatmul.mubr.msk.bf16.vlgmr.msra.gmra.mxu1 %vm261_vm1, %v2150_v25 }
  0x49   : > { %2030 = vmatpush3.bf16.msra.mxu0 %v1136_v28  ;;  %2012 = vmatpush3.bf16.msra.mxu1 %v978_v29 }
  0x4a   : > { %1981 = vmatprep.mubr.msk.bf16.mxu1 %vm261_vm1, %v2284_v5  ;;  %1999 = vmatprep.mubr.msk.bf16.mxu0 %vm261_vm1, %v2306_v13 }
  0x4b   : > { %2093 = vmatprep.subr.msk.bf16.mxu1 %vm286_vm0, %v1813_v30  ;;  %2094 = vmatprep.subr.msk.bf16.mxu0 %vm286_vm0, %v1828_v31 }
  0x50   : > { %2000 = vmatmul.mubr.msk.bf16.gmra.mxu0 %vm261_vm1, %v2315_v15  ;;  %1982 = vmatmul.mubr.msk.bf16.gmra.mxu1 %vm261_vm1, %v2295_v9 }
  0x51   : > { %2003 = vmatprep.mubr.msk.bf16.mxu0 %vm261_vm1, %v2154_v32  ;;  %1985 = vmatprep.mubr.msk.bf16.mxu1 %vm261_vm1, %v2153_v33 }
  0x58   : > { %2004 = vmatmul.mubr.msk.bf16.gmra.mxu0 %vm261_vm1, %v2156_v34  ;;  %1986 = vmatmul.mubr.msk.bf16.gmra.mxu1 %vm261_vm1, %v2155_v35 }
  0x59   : > { %2007 = vmatprep.mubr.msk.bf16.mxu0 %vm261_vm1, %v2157_v36  ;;  %1989 = vmatprep.mubr.msk.bf16.mxu1 %vm261_vm1, %v2154_v32 }
  0x60   : > { %2008 = vmatmul.mubr.msk.bf16.gmra.mxu0 %vm261_vm1, %v2158_v37  ;;  %1990 = vmatmul.mubr.msk.bf16.gmra.mxu1 %vm261_vm1, %v2156_v34 }
  0x61   : > { %2031 = vmatprep.mubr.msk.bf16.mxu0 %vm261_vm1, %v2153_v33  ;;  %2013 = vmatprep.mubr.msk.bf16.mxu1 %vm261_vm1, %v2306_v13 }
  0x68   : > { %2032 = vmatmul.mubr.msk.bf16.vlgmr.msra.gmra.mxu0 %vm261_vm1, %v2155_v35  ;;  %2014 = vmatmul.mubr.msk.bf16.vlgmr.msra.gmra.mxu1 %vm261_vm1, %v2315_v15 }
  0x69   : > { %2066 = vmatpush3.bf16.msra.mxu0 %v1412_v38  ;;  %2048 = vmatpush3.bf16.msra.mxu1 %v1274_v39 }
  0x6a   : > { %2017 = vmatprep.mubr.msk.bf16.mxu1 %vm261_vm1, %v2151_v26  ;;  %2035 = vmatprep.mubr.msk.bf16.mxu0 %vm261_vm1, %v2154_v32 }
  0x70   : > { %2036 = vmatmul.mubr.msk.bf16.gmra.mxu0 %vm261_vm1, %v2156_v34  ;;  %2018 = vmatmul.mubr.msk.bf16.gmra.mxu1 %vm261_vm1, %v2152_v27 }
  0x71   : > { %2039 = vmatprep.mubr.msk.bf16.mxu0 %vm261_vm1, %v2159_v40  ;;  %2021 = vmatprep.mubr.msk.bf16.mxu1 %vm261_vm1, %v2157_v36 }
  0x78   : > { %2040 = vmatmul.mubr.msk.bf16.gmra.mxu0 %vm261_vm1, %v2160_v41  ;;  %2022 = vmatmul.mubr.msk.bf16.gmra.mxu1 %vm261_vm1, %v2158_v37 }
  0x79   : > { %2043 = vmatprep.mubr.msk.bf16.mxu0 %vm261_vm1, %v2162_v42  ;;  %2025 = vmatprep.mubr.msk.bf16.mxu1 %vm261_vm1, %v2161_v43 }
  0x80   : > { %2044 = vmatmul.mubr.msk.bf16.gmra.mxu0 %vm261_vm1, %v2164_v44  ;;  %2026 = vmatmul.mubr.msk.bf16.gmra.mxu1 %vm261_vm1, %v2163_v45 }
  0x81   : > { %2067 = vmatprep.mubr.msk.bf16.mxu0 %vm261_vm1, %v2157_v36  ;;  %2049 = vmatprep.mubr.msk.bf16.mxu1 %vm261_vm1, %v2154_v32 }
  0x88   : > { %2068 = vmatmul.mubr.msk.bf16.vlgmr.msra.gmra.mxu0 %vm261_vm1, %v2158_v37  ;;  %2050 = vmatmul.mubr.msk.bf16.vlgmr.msra.gmra.mxu1 %vm261_vm1, %v2156_v34 }
  0x89   : > { %2071 = vmatprep.mubr.msk.bf16.mxu0 %vm261_vm1, %v2161_v43  ;;  %2053 = vmatprep.mubr.msk.bf16.mxu1 %vm261_vm1, %v2157_v36 }
  0x90   : > { %2072 = vmatmul.mubr.msk.bf16.gmra.mxu0 %vm261_vm1, %v2163_v45  ;;  %2054 = vmatmul.mubr.msk.bf16.gmra.mxu1 %vm261_vm1, %v2158_v37 }
  0x91   : > { %2075 = vmatprep.mubr.msk.bf16.mxu0 %vm261_vm1, %v2165_v46  ;;  %2057 = vmatprep.mubr.msk.bf16.mxu1 %vm261_vm1, %v2162_v42 }
  0x98   : > { %2076 = vmatmul.mubr.msk.bf16.gmra.mxu0 %vm261_vm1, %v2166_v47  ;;  %2058 = vmatmul.mubr.msk.bf16.gmra.mxu1 %vm261_vm1, %v2164_v44 }
  0x99   : > { %2079 = vmatprep.mubr.msk.bf16.mxu0 %vm261_vm1, %v2167_v48  ;;  %2061 = vmatprep.mubr.msk.bf16.mxu1 %vm261_vm1, %v2165_v46 }
  0xa0   : > { %2080 = vmatmul.mubr.msk.bf16.gmra.mxu0 %vm261_vm1, %v2168_v49  ;;  %2062 = vmatmul.mubr.msk.bf16.gmra.mxu1 %vm261_vm1, %v2166_v47 }
  0xd8   : > { %v1925_v50 = vpop.f32.mrf.mxu0  ;;  %v1933_v51 = vpop.f32.mrf.mxu1 }
  0xda   : > { %v324_v52 = vpop.f32.mrf.mxu0  ;;  %v356_v53 = vpop.f32.mrf.mxu1 }
  0xdc   : > { %v1926_v54 = vpop.f32.mrf.mxu0  ;;  %v1934_v55 = vpop.f32.mrf.mxu1 }
  0xde   : > { %v327_v56 = vpop.f32.mrf.mxu0  ;;  %v359_v57 = vpop.f32.mrf.mxu1 }
  0xe0   : > { %v1929_v58 = vpop.f32.mrf.mxu0  ;;  %v1937_v59 = vpop.f32.mrf.mxu1 }
  0xe2   : > { %v340_v60 = vpop.f32.mrf.mxu0  ;;  %v372_v61 = vpop.f32.mrf.mxu1 }
  0xe4   : > { %v1930_v62 = vpop.f32.mrf.mxu0  ;;  %v1938_v63 = vpop.f32.mrf.mxu1 }
  0xe6   : > { %v343_v0 = vpop.f32.mrf.mxu0  ;;  %v2442_v1 = vpop.f32.mrf.mxu1 }
  0xe8   : > { %v1961_v2 = vpop.f32.mrf.mxu0  ;;  %v1943_v3 = vpop.f32.mrf.mxu1 }
  0xe9   : > { %v445_v4 = vadd.f32 %v1943_v3, %v1925_v50 }
  0xea   : > { %v580_v5 = vpop.f32.mrf.mxu0  ;;  %v436_v6 = vpop.f32.mrf.mxu1 }
  0xeb   : > { %v645_v7 = vadd.f32 %v1961_v2, %v445_v4  ;;  %v437_v8 = vadd.f32 %v436_v6, %v324_v52 }
  0xec   : > { %v1962_v9 = vpop.f32.mrf.mxu0  ;;  %v1944_v10 = vpop.f32.mrf.mxu1 }
  0xed   : > { %v2444_v11 = vadd.f32 %v580_v5, %v437_v8  ;;  %v448_v12 = vadd.f32 %v1944_v10, %v1926_v54 }
  0xee   : > { %v583_v13 = vpop.f32.mrf.mxu0  ;;  %v439_v14 = vpop.f32.mrf.mxu1 }
  0xef   : > { %v2446_v15 = vadd.f32 %v1962_v9, %v448_v12  ;;  %v440_v16 = vadd.f32 %v439_v14, %v327_v56 }
  0xf0   : > { %v1965_v17 = vpop.f32.mrf.mxu0  ;;  %v1947_v18 = vpop.f32.mrf.mxu1 }
  0xf1   : > { %v2448_v19 = vadd.f32 %v583_v13, %v440_v16  ;;  %v461_v20 = vadd.f32 %v1947_v18, %v1929_v58 }
  0xf2   : > { %v596_v21 = vpop.f32.mrf.mxu0  ;;  %v452_v22 = vpop.f32.mrf.mxu1 }
  0xf3   : > { %v649_v23 = vadd.f32 %v1965_v17, %v461_v20  ;;  %v453_v24 = vadd.f32 %v452_v22, %v340_v60 }
  0xf4   : > { %v1966_v25 = vpop.f32.mrf.mxu0  ;;  %v1948_v26 = vpop.f32.mrf.mxu1 }
  0xf5   : > { %v2450_v27 = vadd.f32 %v596_v21, %v453_v24  ;;  %v464_v28 = vadd.f32 %v1948_v26, %v1930_v62 }
  0xf6   : > { %v599_v29 = vpop.f32.mrf.mxu0  ;;  %v455_v30 = vpop.f32.mrf.mxu1 }
  0xf7   : > { %v2452_v31 = vadd.f32 %v1966_v25, %v464_v28  ;;  %v456_v32 = vadd.f32 %v455_v30, %v343_v0 }
  0xf8   : > { %v1969_v33 = vpop.f32.mrf.mxu0  ;;  %v1951_v34 = vpop.f32.mrf.mxu1 }
  0xf9   : > { %v2454_v35 = vadd.f32 %v599_v29, %v456_v32  ;;  %v477_v36 = vadd.f32 %v1951_v34, %v1933_v51 }
  0xfa   : > { %v612_v37 = vpop.f32.mrf.mxu0  ;;  %v468_v38 = vpop.f32.mrf.mxu1 }
  0xfb   : > { %v653_v39 = vadd.f32 %v1969_v33, %v477_v36  ;;  %v469_v40 = vadd.f32 %v468_v38, %v356_v53 }
  0xfc   : > { %v1970_v41 = vpop.f32.mrf.mxu0  ;;  %v1952_v42 = vpop.f32.mrf.mxu1 }
  0xfd   : > { %v2456_v43 = vadd.f32 %v612_v37, %v469_v40  ;;  %v480_v44 = vadd.f32 %v1952_v42, %v1934_v55 }
  0xfe   : > { %v615_v45 = vpop.f32.mrf.mxu0  ;;  %v471_v46 = vpop.f32.mrf.mxu1 }
  0xff   : > { %v2458_v47 = vadd.f32 %v1970_v41, %v480_v44  ;;  %v472_v48 = vadd.f32 %v471_v46, %v359_v57 }
 0x100   : > { %v1973_v49 = vpop.f32.mrf.mxu0  ;;  %v1955_v50 = vpop.f32.mrf.mxu1 }
 0x101   : > { %v2460_v52 = vadd.f32 %v615_v45, %v472_v48  ;;  %v493_v54 = vadd.f32 %v1955_v50, %v1937_v59 }
 0x102   : > { %v628_v51 = vpop.f32.mrf.mxu0  ;;  %v484_v56 = vpop.f32.mrf.mxu1 }
 0x103   : > { %v657_v58 = vadd.f32 %v1973_v49, %v493_v54  ;;  %v485_v60 = vadd.f32 %v484_v56, %v372_v61 }
 0x104   : > { %v1974_v53 = vpop.f32.mrf.mxu0  ;;  %v1956_v62 = vpop.f32.mrf.mxu1 }
 0x105   : > { %v2462_v0 = vadd.f32 %v628_v51, %v485_v60  ;;  %v496_v2 = vadd.f32 %v1956_v62, %v1938_v63 }
 0x106   : > { %v631_v55 = vpop.f32.mrf.mxu0  ;;  %v487_v3 = vpop.f32.mrf.mxu1 }
 0x107   : > { %v2464_v4 = vadd.f32 %v1974_v53, %v496_v2  ;;  %v488_v57 = vadd.f32 %v487_v3, %v2442_v1 }
 0x108   : > { %v1997_v5 = vpop.f32.mrf.mxu0  ;;  %v1979_v6 = vpop.f32.mrf.mxu1 }
 0x109   : > { %2638 = vst [vmem:[#allocation2_spill] sm:$0xff] %v2464_v4  ;;  %v2467_v8 = vadd.f32 %v631_v55, %v488_v57  ;;  %v803_v59 = vadd.f32 %v1979_v6, %v645_v7 }
 0x10a   : > { %v2469_v9 = vpop.f32.mrf.mxu0  ;;  %v738_v10 = vpop.f32.mrf.mxu1 }
 0x10b   : > { %2639 = vst [vmem:[#allocation3_spill] sm:$0xff] %v2467_v8  ;;  %v2471_v61 = vadd.f32 %v1997_v5, %v803_v59 }
 0x10c   : > { %v2473_v12 = vpop.f32.mrf.mxu0  ;;  %v1980_v13 = vpop.f32.mrf.mxu1 }
 0x10e   : > { %v2475_v63 = vpop.f32.mrf.mxu0  ;;  %v741_v14 = vpop.f32.mrf.mxu1 }
 0x10f   : > { %v802_v8 = vadd.f32 %v741_v14, %v2448_v19 }
 0x110   : > { %v2001_v16 = vpop.f32.mrf.mxu0  ;;  %v1983_v17 = vpop.f32.mrf.mxu1 }
 0x111   : > { %v807_v18 = vadd.f32 %v1983_v17, %v649_v23 }
 0x112   : > { %v2477_v1 = vpop.f32.mrf.mxu0  ;;  %v2479_v20 = vpop.f32.mrf.mxu1 }
 0x113   : > { %v2481_v21 = vadd.f32 %v2001_v16, %v807_v18 }
 0x114   : > { %v2483_v7 = vpop.f32.mrf.mxu0  ;;  %v2485_v22 = vpop.f32.mrf.mxu1 }
 0x115   : > { %v808_v19 = vadd.f32 %v2485_v22, %v2452_v31 }
 0x116   : > { %v2487_v24 = vpop.f32.mrf.mxu0  ;;  %v2489_v25 = vpop.f32.mrf.mxu1 }
 0x118   : > { %v2005_v26 = vpop.f32.mrf.mxu0  ;;  %v1987_v28 = vpop.f32.mrf.mxu1 }
 0x119   : > { %v811_v29 = vadd.f32 %v1987_v28, %v653_v39 }
 0x11a   : > { %v2491_v30 = vpop.f32.mrf.mxu0  ;;  %v2493_v23 = vpop.f32.mrf.mxu1 }
 0x11b   : > { %v2495_v32 = vadd.f32 %v2005_v26, %v811_v29  ;;  %v809_v31 = vadd.f32 %v2493_v23, %v2456_v43 }
 0x11c   : > { %v2497_v33 = vpop.f32.mrf.mxu0  ;;  %v2499_v34 = vpop.f32.mrf.mxu1 }
 0x11d   : > { %v947_v43 = vadd.f32 %v2491_v30, %v809_v31 }
 0x11e   : > { %v2501_v36 = vpop.f32.mrf.mxu0  ;;  %v2503_v37 = vpop.f32.mrf.mxu1 }
 0x120   : > { %v2009_v38 = vpop.f32.mrf.mxu0  ;;  %v1991_v40 = vpop.f32.mrf.mxu1 }
 0x121   : > { %v815_v41 = vadd.f32 %v1991_v40, %v657_v58 }
 0x122   : > { %v2505_v42 = vpop.f32.mrf.mxu0  ;;  %v2507_v39 = vpop.f32.mrf.mxu1 }
 0x123   : > { %v2509_v44 = vadd.f32 %v2009_v38, %v815_v41  ;;  %v813_v30 = vadd.f32 %v2507_v39, %v2462_v0 }
 0x124   : > { %v2511_v45 = vpop.f32.mrf.mxu0  ;;  %v2513_v46 = vpop.f32.mrf.mxu1 }
 0x125   : > { %2640 = vst [vmem:[#allocation4_spill] sm:$0xff] %v2509_v44  ;;  %2641 = vst [vmem:[#allocation5_spill] sm:$0xff] %v2511_v45  ;;  %v801_v44 = vadd.f32 %v738_v10, %v2444_v11 }
 0x126   : > { %2642 = vst [vmem:[#allocation6_spill] sm:$0xff] %v2513_v46  ;;  %v2515_v48 = vpop.f32.mrf.mxu0  ;;  %v2517_v49 = vpop.f32.mrf.mxu1 }
 0x127   : > { %2643 = vst [vmem:[#allocation7_spill] sm:$0xff] %v2515_v48  ;;  %2644 = vst [vmem:[#allocation8_spill] sm:$0xff] %v2517_v49 }
 0x128   : > { %v2033_v50 = vpop.f32.mrf.mxu0  ;;  %v2015_v54 = vpop.f32.mrf.mxu1 }
 0x12a   : > { %v1172_v51 = vpop.f32.mrf.mxu0  ;;  %v1014_v56 = vpop.f32.mrf.mxu1 }
 0x12c   : > { %v2034_v60 = vpop.f32.mrf.mxu0  ;;  %v2016_v58 = vpop.f32.mrf.mxu1 }
 0x12e   : > { %v1175_v53 = vpop.f32.mrf.mxu0  ;;  %v1017_v62 = vpop.f32.mrf.mxu1 }
 0x130   : > { %v2519_v2 = vpop.f32.mrf.mxu0  ;;  %v2019_v55 = vpop.f32.mrf.mxu1 }
 0x132   : > { %v2521_v3 = vpop.f32.mrf.mxu0  ;;  %v1030_v57 = vpop.f32.mrf.mxu1 }
 0x134   : > { %v2523_v5 = vpop.f32.mrf.mxu0  ;;  %v2020_v6 = vpop.f32.mrf.mxu1 }
 0x136   : > { %v2525_v59 = vpop.f32.mrf.mxu0  ;;  %v1033_v16 = vpop.f32.mrf.mxu1 }
 0x138   : > { %v2527_v17 = vpop.f32.mrf.mxu0  ;;  %v2529_v18 = vpop.f32.mrf.mxu1 }
 0x139   : > { %2645 = vst [vmem:[#allocation9_spill] sm:$0xff] %v2527_v17 }
 0x13a   : > { %v2531_v26 = vpop.f32.mrf.mxu0  ;;  %v2533_v28 = vpop.f32.mrf.mxu1 }
 0x13b   : > { %2646 = vst [vmem:[#allocation10_spill] sm:$0xff] %v2531_v26  ;;  %v804_v26 = vadd.f32 %v1980_v13, %v2446_v15  ;;  %v805_v15 = vadd.f32 %v2479_v20, %v2450_v27 }
 0x13c   : > { %v2535_v29 = vpop.f32.mrf.mxu0  ;;  %v2537_v38 = vpop.f32.mrf.mxu1 }
 0x13d   : > { %2647 = vst [vmem:[#allocation11_spill] sm:$0xff] %v2535_v29  ;;  %v939_v29 = vadd.f32 %v2469_v9, %v801_v44  ;;  %v942_v10 = vadd.f32 %v2473_v12, %v804_v26  ;;  %v1079_v9 = vadd.f32 %v2015_v54, %v2471_v61  ;;  %v806_v12 = vadd.f32 %v2489_v25, %v2454_v35 }
 0x13e   : > { %v2539_v40 = vpop.f32.mrf.mxu0  ;;  %v2541_v41 = vpop.f32.mrf.mxu1  ;;  %v946_v61 = vadd.f32 %v2483_v7, %v808_v19  ;;  %v812_v35 = vadd.f32 %v2499_v34, %v2458_v47  ;;  %v810_v47 = vadd.f32 %v2503_v37, %v2460_v52 }
 0x13f   : > { %2648 = vst [vmem:[#allocation12_spill] sm:$0xff] %v2539_v40  ;;  %v1077_v4 = vadd.f32 %v1014_v56, %v939_v29  ;;  %v1080_v14 = vadd.f32 %v2016_v58, %v942_v10 }
 0x140   : > { %v2544_v48 = vpop.f32.mrf.mxu0  ;;  %v2546_v45 = vpop.f32.mrf.mxu1  ;;  %v1084_v10 = vadd.f32 %v2020_v6, %v946_v61  ;;  %v950_v19 = vadd.f32 %v2497_v33, %v812_v35 }
 0x141   : > { %2649 = vst [vmem:[#allocation13_spill] sm:$0xff] %v2544_v48  ;;  %v1235_v56 = vadd.f32 %v1172_v51, %v1077_v4  ;;  %v1238_v20 = vadd.f32 %v2034_v60, %v1080_v14 }
 0x142   : > { %v2548_v17 = vpop.f32.mrf.mxu0  ;;  %v2551_v49 = vpop.f32.mrf.mxu1 }
 0x143   : > { %2650 = vst [vmem:[#allocation14_spill] sm:$0xff] %v2548_v17  ;;  %v940_v17 = vadd.f32 %v2475_v63, %v802_v8  ;;  %v943_v8 = vadd.f32 %v2477_v1, %v805_v15  ;;  %v1237_v63 = vadd.f32 %v2033_v50, %v1079_v9  ;;  %v1083_v1 = vadd.f32 %v2019_v55, %v2481_v21 }
 0x144   : > { %v2555_v46 = vpop.f32.mrf.mxu0  ;;  %v2557_v40 = vpop.f32.mrf.mxu1 }
 0x145   : > { %2651 = vst [vmem:[#allocation15_spill] sm:$0xff] %v2555_v46  ;;  %v1078_v29 = vadd.f32 %v1017_v62, %v940_v17  ;;  %v1081_v4 = vadd.f32 %v1030_v57, %v943_v8  ;;  %v944_v62 = vadd.f32 %v2487_v24, %v806_v12  ;;  %v1241_v21 = vadd.f32 %v2519_v2, %v1083_v1  ;;  %v2655_v1 = vld [vmem:[#allocation3_spill] sm:$0xff] }
 0x146   : > { %v2559_v11 = vpop.f32.mrf.mxu0  ;;  %v2562_v48 = vpop.f32.mrf.mxu1  ;;  %v948_v12 = vadd.f32 %v2501_v36, %v810_v47  ;;  %v1085_v8 = vadd.f32 %v2533_v28, %v947_v43 }
 0x147   : > { %2652 = vst [vmem:[#allocation16_spill] sm:$0xff] %v2559_v11  ;;  %v1236_v22 = vadd.f32 %v1175_v53, %v1078_v29  ;;  %v1082_v15 = vadd.f32 %v1033_v16, %v944_v62  ;;  %v1239_v23 = vadd.f32 %v2521_v3, %v1081_v4  ;;  %v1242_v3 = vadd.f32 %v2523_v5, %v1084_v10  ;;  %v2654_v62 = vld [vmem:[#allocation6_spill] sm:$0xff] }
 0x148   : > { %v2069_v13 = vpop.f32.mrf.mxu0  ;;  %v2051_v44 = vpop.f32.mrf.mxu1  ;;  %v1086_v31 = vadd.f32 %v2541_v41, %v948_v12 }
 0x149   : > { %v1375_v51 = vadd.f32 %v2051_v44, %v1237_v63 }
 0x14a   : > { %v1448_v11 = vpop.f32.mrf.mxu0  ;;  %v1310_v26 = vpop.f32.mrf.mxu1 }
 0x14b   : > { %v1373_v46 = vadd.f32 %v1310_v26, %v1235_v56  ;;  %v1513_v53 = vadd.f32 %v2069_v13, %v1375_v51  ;;  %v1240_v13 = vadd.f32 %v2525_v59, %v1082_v15  ;;  %v1087_v26 = vadd.f32 %v2529_v18, %v2495_v32 }
 0x14c   : > { %v2070_v27 = vpop.f32.mrf.mxu0  ;;  %v2052_v54 = vpop.f32.mrf.mxu1 }
 0x14d   : > { %v1376_v25 = vadd.f32 %v2052_v54, %v1238_v20  ;;  %v1511_v17 = vadd.f32 %v1448_v11, %v1373_v46  ;;  %v1550_v56 = vmul.f32 %v1513_v53, %v1513_v53  ;;  %v951_v20 = vadd.f32 %v2505_v42, %v813_v30  ;;  %v2658_v42 = vld [vmem:[#allocation10_spill] sm:$0xff] }
 0x14e   : > { %v1451_v58 = vpop.f32.mrf.mxu0  ;;  %v1313_v50 = vpop.f32.mrf.mxu1  ;;  %v1088_v54 = vadd.f32 %v2537_v38, %v950_v19  ;;  %v1243_v10 = vadd.f32 %v2658_v42, %v1085_v8 }
 0x14f   : > { %v1374_v7 = vadd.f32 %v1313_v50, %v1236_v22  ;;  %v1514_v34 = vadd.f32 %v2070_v27, %v1376_v25  ;;  %v1548_v55 = vmul.f32 %v1511_v17, %v1511_v17  ;;  %v2656_v25 = vld [vmem:[#allocation8_spill] sm:$0xff] }
 0x150   : > { %v2073_v60 = vpop.f32.mrf.mxu0  ;;  %v2055_v9 = vpop.f32.mrf.mxu1  ;;  %v814_v50 = vadd.f32 %v2656_v25, %v2655_v1 }
 0x151   : > { %v1512_v57 = vadd.f32 %v1451_v58, %v1374_v7  ;;  %v1379_v33 = vadd.f32 %v2055_v9, %v1241_v21  ;;  %v1551_v63 = vmul.f32 %v1514_v34, %v1514_v34  ;;  %v2653_v58 = vld [vmem:[#allocation2_spill] sm:$0xff]  ;;  %v2660_v21 = vld [vmem:[#allocation12_spill] sm:$0xff] }
 0x152   : > { %v1464_v24 = vpop.f32.mrf.mxu0  ;;  %v1326_v46 = vpop.f32.mrf.mxu1  ;;  %v816_v35 = vadd.f32 %v2654_v62, %v2653_v58 }
 0x153   : > { %v1527_v6 = vadd.f32 %v1512_v57, %v1511_v17  ;;  %v1549_v16 = vmul.f32 %v1512_v57, %v1512_v57  ;;  %v1377_v11 = vadd.f32 %v1326_v46, %v1239_v23  ;;  %v1517_v22 = vadd.f32 %v2073_v60, %v1379_v33  ;;  %v2657_v17 = vld [vmem:[#allocation9_spill] sm:$0xff]  ;;  %v2659_v23 = vld [vmem:[#allocation11_spill] sm:$0xff] }
 0x154   : > { %v2074_v14 = vpop.f32.mrf.mxu0  ;;  %v2056_v44 = vpop.f32.mrf.mxu1  ;;  %v1245_v7 = vadd.f32 %v2657_v17, %v1087_v26  ;;  %v1089_v57 = vadd.f32 %v2551_v49, %v951_v20  ;;  %v2662_v49 = vld [vmem:[#allocation7_spill] sm:$0xff]  ;;  %v2664_v26 = vld [vmem:[#allocation14_spill] sm:$0xff] }
 0x155   : > { %v1528_v52 = vadd.f32 %v1527_v6, %v1513_v53  ;;  %v1564_v37 = vadd.f32 %v1549_v16, %v1548_v55  ;;  %v1515_v2 = vadd.f32 %v1464_v24, %v1377_v11  ;;  %v1380_v27 = vadd.f32 %v2056_v44, %v1242_v3  ;;  %v2661_v11 = vld [vmem:[#allocation5_spill] sm:$0xff] }
 0x156   : > { %v1467_v29 = vpop.f32.mrf.mxu0  ;;  %v1329_v0 = vpop.f32.mrf.mxu1  ;;  %v1246_v53 = vadd.f32 %v2659_v23, %v1088_v54  ;;  %v1554_v46 = vmul.f32 %v1517_v22, %v1517_v22  ;;  %v954_v30 = vadd.f32 %v2661_v11, %v816_v35  ;;  %v1247_v8 = vadd.f32 %v2664_v26, %v1089_v57 }
 0x157   : > { %v1565_v39 = vadd.f32 %v1564_v37, %v1550_v56  ;;  %v1529_v5 = vadd.f32 %v1528_v52, %v1514_v34  ;;  %v1378_v59 = vadd.f32 %v1329_v0, %v1240_v13  ;;  %v1552_v51 = vmul.f32 %v1515_v2, %v1515_v2 }
 0x158   : > { %v2077_v61 = vpop.f32.mrf.mxu0  ;;  %v2059_v36 = vpop.f32.mrf.mxu1  ;;  %v1518_v41 = vadd.f32 %v2074_v14, %v1380_v27  ;;  %v1244_v34 = vadd.f32 %v2660_v21, %v1086_v31  ;;  %v1092_v54 = vadd.f32 %v2557_v40, %v954_v30 }
 0x159   : > { %v1530_v4 = vadd.f32 %v1529_v5, %v1515_v2  ;;  %v1566_v32 = vadd.f32 %v1565_v39, %v1551_v63  ;;  %v1516_v18 = vadd.f32 %v1467_v29, %v1378_v59  ;;  %v1383_v24 = vadd.f32 %v2059_v36, %v1245_v7  ;;  %v2663_v29 = vld [vmem:[#allocation4_spill] sm:$0xff] }
 0x15a   : > { %v1480_v28 = vpop.f32.mrf.mxu0  ;;  %v1342_v38 = vpop.f32.mrf.mxu1  ;;  %v1555_v33 = vmul.f32 %v1518_v41, %v1518_v41  ;;  %v952_v2 = vadd.f32 %v2662_v49, %v814_v50  ;;  %v1091_v12 = vadd.f32 %v2546_v45, %v2663_v29  ;;  %v2665_v45 = vld [vmem:[#allocation13_spill] sm:$0xff]  ;;  %v2666_v50 = vld [vmem:[#allocation15_spill] sm:$0xff]  ;;  %v2667_v7 = vld [vmem:[#allocation16_spill] sm:$0xff] }
 0x15b   : > { %v1567_v15 = vadd.f32 %v1566_v32, %v1552_v51  ;;  %v1531_v60 = vadd.f32 %v1530_v4, %v1516_v18  ;;  %v1553_v9 = vmul.f32 %v1516_v18, %v1516_v18  ;;  %v1381_v19 = vadd.f32 %v1342_v38, %v1243_v10 }
 0x15c   : > { %v2078_v43 = vpop.f32.mrf.mxu0  ;;  %v2060_v47 = vpop.f32.mrf.mxu1  ;;  %v1521_v63 = vadd.f32 %v2077_v61, %v1383_v24  ;;  %v1090_v31 = vadd.f32 %v2562_v48, %v952_v2  ;;  %v1250_v17 = vadd.f32 %v2666_v50, %v1092_v54 }
 0x15d   : > { %v1532_v55 = vadd.f32 %v1531_v60, %v1517_v22  ;;  %v1568_v6 = vadd.f32 %v1567_v15, %v1553_v9  ;;  %v1519_v3 = vadd.f32 %v1480_v28, %v1381_v19  ;;  %v1384_v14 = vadd.f32 %v2060_v47, %v1246_v53 }
 0x15e   : > { %v1483_v16 = vpop.f32.mrf.mxu0  ;;  %v1345_v13 = vpop.f32.mrf.mxu1  ;;  %v1249_v28 = vadd.f32 %v2665_v45, %v1091_v12  ;;  %v1558_v61 = vmul.f32 %v1521_v63, %v1521_v63  ;;  %v1248_v40 = vadd.f32 %v2667_v7, %v1090_v31 }
 0x15f   : > { %v1569_v44 = vadd.f32 %v1568_v6, %v1554_v46  ;;  %v1533_v56 = vadd.f32 %v1532_v55, %v1518_v41  ;;  %v1382_v52 = vadd.f32 %v1345_v13, %v1244_v34  ;;  %v1556_v5 = vmul.f32 %v1519_v3, %v1519_v3 }
 0x160   : > { %v2081_v37 = vpop.f32.mrf.mxu0  ;;  %v2063_v0 = vpop.f32.mrf.mxu1  ;;  %v1522_v22 = vadd.f32 %v2078_v43, %v1384_v14 }
 0x161   : > { %v1534_v39 = vadd.f32 %v1533_v56, %v1519_v3  ;;  %v1570_v27 = vadd.f32 %v1569_v44, %v1555_v33  ;;  %v1520_v59 = vadd.f32 %v1483_v16, %v1382_v52  ;;  %v1387_v42 = vadd.f32 %v2063_v0, %v1249_v28 }
 0x162   : > { %v1496_v20 = vpop.f32.mrf.mxu0  ;;  %v1358_v36 = vpop.f32.mrf.mxu1  ;;  %v1559_v10 = vmul.f32 %v1522_v22, %v1522_v22 }
 0x163   : > { %v1571_v4 = vadd.f32 %v1570_v27, %v1556_v5  ;;  %v1535_v51 = vadd.f32 %v1534_v39, %v1520_v59  ;;  %v1557_v32 = vmul.f32 %v1520_v59, %v1520_v59  ;;  %v1385_v18 = vadd.f32 %v1358_v36, %v1247_v8 }
 0x164   : > { %v2064_v58 = vpop.f32.mrf.mxu1  ;;  %v2082_v25 = vpop.f32.mrf.mxu0  ;;  %v1525_v57 = vadd.f32 %v2081_v37, %v1387_v42 }
 0x165   : > { %v1536_v62 = vadd.f32 %v1535_v51, %v1521_v63  ;;  %v1572_v35 = vadd.f32 %v1571_v4, %v1557_v32  ;;  %v1523_v1 = vadd.f32 %v1496_v20, %v1385_v18  ;;  %v1388_v41 = vadd.f32 %v2064_v58, %v1250_v17 }
 0x166   : > { %v1361_v48 = vpop.f32.mrf.mxu1  ;;  %v1499_v53 = vpop.f32.mrf.mxu0  ;;  %v1562_v46 = vmul.f32 %v1525_v57, %v1525_v57 }
 0x167   : > { %v1573_v38 = vadd.f32 %v1572_v35, %v1558_v61  ;;  %v1537_v15 = vadd.f32 %v1536_v62, %v1522_v22  ;;  %v1386_v60 = vadd.f32 %v1361_v48, %v1248_v40  ;;  %v1560_v43 = vmul.f32 %v1523_v1, %v1523_v1 }
 0x168   : > { %v1526_v47 = vadd.f32 %v2082_v25, %v1388_v41 }
 0x169   : > { %v1538_v9 = vadd.f32 %v1537_v15, %v1523_v1  ;;  %v1574_v23 = vadd.f32 %v1573_v38, %v1559_v10  ;;  %v1524_v24 = vadd.f32 %v1499_v53, %v1386_v60 }
 0x16a   : > { %v1563_v16 = vmul.f32 %v1526_v47, %v1526_v47 }
 0x16b   : > { %v1575_v19 = vadd.f32 %v1574_v23, %v1560_v43  ;;  %v1539_v21 = vadd.f32 %v1538_v9, %v1524_v24  ;;  %v1561_v34 = vmul.f32 %v1524_v24, %v1524_v24 }
 0x16d   : > { %v1540_v55 = vadd.f32 %v1539_v21, %v1525_v57  ;;  %v1576_v6 = vadd.f32 %v1575_v19, %v1561_v34 }
 0x16f   : > { %v1541_v11 = vadd.f32 %v1540_v55, %v1526_v47  ;;  %v1577_v30 = vadd.f32 %v1576_v6, %v1562_v46 }
 0x171   : > { %v1542_v3 = vrot.slane %v1541_v11, 4  ;;  %v1578_v14 = vadd.f32 %v1577_v30, %v1563_v16 }
 0x173   : > { %v1543_v13 = vadd.f32 %v1542_v3, %v1541_v11  ;;  %v1579_v33 = vrot.slane %v1578_v14, 4 }
 0x175   : > { %v1544_v44 = vrot.slane %v1543_v13, 2  ;;  %v1580_v56 = vadd.f32 %v1579_v33, %v1578_v14 }
 0x177   : > { %v1545_v52 = vadd.f32 %v1544_v44, %v1543_v13  ;;  %v1581_v49 = vrot.slane %v1580_v56, 2 }
 0x179   : > { %v1546_v37 = vrot.slane %v1545_v52, 1  ;;  %v1582_v2 = vadd.f32 %v1581_v49, %v1580_v56 }
 0x17b   : > { %v1583_v29 = vrot.slane %v1582_v2, 1  ;;  %v1547_v12 = vadd.f32 %v1546_v37, %v1545_v52  ;;  %1590 = sbr.rel (%p1837_p7) target bundleno = 386 (0x182), region = 32 }
 0x17d   : > { %v1584_v26 = vadd.f32 %v1583_v29, %v1582_v2 }
 0x17f   : > { %v1586_v8 = vsel %vm1585_vm2, %v1547_v12, %v1584_v26 }
 0x180   : > { %v2209_v63 = vmov 0.0  }
 0x181   : > { %1591 = vst [vmem:[%s2275_s27] sm:$0x3] %v2209_v63 }
 0x182 PF:  {}
 0x188   : > { %v1592_v0 = vld [vmem:[%s2275_s27] sm:$0x3] }
 0x189   : > { %v1593_v39 = vadd.f32 %v1592_v0, %v1586_v8 }
 0x18b   : > { %1594 = vst [vmem:[%s2275_s27] sm:$0x3] %v1593_v39 }
 0x18c PF: > { %s12_s13 = sadd.s32 1, %s2207_s13   ;;  %s2668_s9 = smov %s2199_s11 }
 0x18d   : > { %p9_p8 = scmp.ge.s32.totalorder %s12_s13, 6   ;;  %s2669_s10 = smov %s2203_s12 }
 0x18e   : > { %s2670_s11 = smov %s2673_s14  ;;  %s2671_s12 = smov %s2677_s15 }
 0x18f   :  { %11 = sbr.rel (!%p9_p8) target bundleno = 3 (0x3), region = 77 }

</bundles_post_ra>
